<compile_context>
chip_gen: v7x
topology: tpu7x:2x2x1
jax: 0.10.0
libtpu: 0.0.40
codegen_flags: <defaults>
</compile_context>

<pallas_src>
import functools

import jax
import jax.numpy as jnp
import numpy as np
from jax.experimental import pallas as pl
from jax.experimental.pallas import tpu as pltpu


# --------------------------------------------------------------------------
# Fused conv(matmul) + BatchNorm Pallas kernel
# --------------------------------------------------------------------------
def _fused_conv_bn_kernel(p_ref, w_ref, g_ref, b_ref, o_ref,
                          sum_ref, sq_ref, *, eps, m_total):
    # p_ref: (tm, K) im2col patch tile
    # w_ref: (K, Cpad) weight matrix (Cout zero-padded to 128 lanes)
    # g_ref/b_ref: (1, Cpad) BN affine params
    # o_ref: (tm, Cpad) normalized output tile (written only in phase 1)
    # sum_ref/sq_ref: (1, Cpad) persistent VMEM accumulators
    phase = pl.program_id(0)
    i = pl.program_id(1)

    # Conv tile (recomputed in phase 1; K is tiny, so recompute is far cheaper
    # than a full HBM round trip of the conv output).  Default MXU precision.
    y = jnp.dot(p_ref[...], w_ref[...], preferred_element_type=jnp.float32)

    @pl.when((phase == 0) & (i == 0))
    def _init():
        sum_ref[...] = jnp.zeros_like(sum_ref)
        sq_ref[...] = jnp.zeros_like(sq_ref)

    @pl.when(phase == 0)
    def _accumulate():
        # One-pass statistics: per-channel sum and sum of squares.
        sum_ref[...] = sum_ref[...] + jnp.sum(y, axis=0, keepdims=True)
        sq_ref[...] = sq_ref[...] + jnp.sum(y * y, axis=0, keepdims=True)

    @pl.when(phase == 1)
    def _normalize():
        inv_m = 1.0 / m_total                                 # python const
        mean = sum_ref[...] * inv_m
        var = sq_ref[...] * inv_m - mean * mean               # biased var
        inv = jax.lax.rsqrt(var + eps)                        # EUP slot
        o_ref[...] = (y - mean) * inv * g_ref[...] + b_ref[...]


# --------------------------------------------------------------------------
# Glue: im2col + wrapper
# --------------------------------------------------------------------------
def _round_up(a, b):
    return ((a + b - 1) // b) * b


def _im2col(x, kH, kW, stride, padding, dilation):
    """x: (N, Cin, H, W) -> patches (N*Ho*Wo, Cin*kH*kW), Ho, Wo.

    Column ordering matches weight.reshape(Cout, Cin*kH*kW):
    index = c*kH*kW + i*kW + j.
    """
    N, C, H, W = x.shape
    xp = jnp.pad(x, ((0, 0), (0, 0), (padding, padding), (padding, padding)))
    Ho = (H + 2 * padding - dilation * (kH - 1) - 1) // stride + 1
    Wo = (W + 2 * padding - dilation * (kW - 1) - 1) // stride + 1
    cols = []
    for i in range(kH):
        for j in range(kW):
            patch = xp[:, :,
                       i * dilation: i * dilation + stride * (Ho - 1) + 1: stride,
                       j * dilation: j * dilation + stride * (Wo - 1) + 1: stride]
            cols.append(patch)                               # (N, C, Ho, Wo)
    cols = jnp.stack(cols, axis=2)                           # (N, C, kH*kW, Ho, Wo)
    cols = cols.reshape(N, C * kH * kW, Ho, Wo)
    cols = cols.transpose(0, 2, 3, 1).reshape(N * Ho * Wo, C * kH * kW)
    return cols, Ho, Wo


def conv2d_batchnorm(x, weight, gamma, beta, *, stride=1, padding=1,
                     dilation=1, eps=1e-5, tm=512):
    """x: (N, Cin, H, W) f32; weight: (Cout, Cin, kH, kW); gamma/beta: (Cout,)
    Returns (N, Cout, Ho, Wo) f32 (training-mode BatchNorm over the batch)."""
    N, Cin, H, W = x.shape
    Cout, _, kH, kW = weight.shape

    patches, Ho, Wo = _im2col(x, kH, kW, stride, padding, dilation)
    M, K = patches.shape                                     # M = N*Ho*Wo

    # ---- lane-dense channel padding + row tiling -------------------------
    Cpad = _round_up(Cout, 128)
    tm = min(tm, _round_up(M, 8))                            # tile rows, mult of 8
    M_pad = _round_up(M, tm)
    if M_pad != M:
        # Zero rows: conv output of a zero patch row is 0 -> contributes 0 to
        # both sum and sum-of-squares, so BN statistics (divided by true M)
        # are exact; the padded output rows are sliced away below.
        patches = jnp.pad(patches, ((0, M_pad - M), (0, 0)))

    w_mat = weight.reshape(Cout, Cin * kH * kW).T            # (K, Cout)
    w_mat = jnp.pad(w_mat, ((0, 0), (0, Cpad - Cout)))       # (K, Cpad)
    gamma_p = jnp.pad(gamma.reshape(1, Cout), ((0, 0), (0, Cpad - Cout)))
    beta_p = jnp.pad(beta.reshape(1, Cout), ((0, 0), (0, Cpad - Cout)))

    n_m = M_pad // tm

    out = pl.pallas_call(
        functools.partial(_fused_conv_bn_kernel, eps=eps, m_total=float(M)),
        out_shape=jax.ShapeDtypeStruct((M_pad, Cpad), jnp.float32),
        grid_spec=pltpu.PrefetchScalarGridSpec(
            num_scalar_prefetch=0,
            grid=(2, n_m),                                   # (phase, m_tile)
            in_specs=[
                pl.BlockSpec((tm, K), lambda p, i: (i, 0)),
                pl.BlockSpec((K, Cpad), lambda p, i: (0, 0)),
                pl.BlockSpec((1, Cpad), lambda p, i: (0, 0)),
                pl.BlockSpec((1, Cpad), lambda p, i: (0, 0)),
            ],
            # Output block stays at 0 during phase 0 (no HBM writeback of the
            # raw conv), and sweeps the tiles in phase 1.
            out_specs=pl.BlockSpec((tm, Cpad), lambda p, i: (p * i, 0)),
            scratch_shapes=[pltpu.VMEM((1, Cpad), jnp.float32),   # sum
                            pltpu.VMEM((1, Cpad), jnp.float32)],  # sum of sq
        ),
        compiler_params=pltpu.CompilerParams(
            # Both axes carry the stats accumulator -> must stay sequential.
            dimension_semantics=("arbitrary", "arbitrary"),
            vmem_limit_bytes=32 * 1024 * 1024,
        ),
    )(patches, w_mat, gamma_p, beta_p)

    out = out[:M, :Cout]                                     # drop padding
    return out.reshape(N, Ho, Wo, Cout).transpose(0, 3, 1, 2)


# --------------------------------------------------------------------------
# Reference (plain JAX, full f32) for verification
# --------------------------------------------------------------------------
def _reference(x, weight, gamma, beta, *, stride, padding, dilation, eps):
    conv = jax.lax.conv_general_dilated(
        x, weight,
        window_strides=(stride, stride),
        padding=[(padding, padding), (padding, padding)],
        rhs_dilation=(dilation, dilation),
        dimension_numbers=("NCHW", "OIHW", "NCHW"),
        precision=jax.lax.Precision.HIGHEST,
    )
    mean = jnp.mean(conv, axis=(0, 2, 3), keepdims=True)
    var = jnp.mean((conv - mean) ** 2, axis=(0, 2, 3), keepdims=True)
    g = gamma.reshape(1, -1, 1, 1)
    b = beta.reshape(1, -1, 1, 1)
    return (conv - mean) * jax.lax.rsqrt(var + eps) * g + b


def _run_case(key, N, Cin, H, W, Cout, k, stride, padding, dilation, eps):
    kx, kw = jax.random.split(key)
    x = jax.random.normal(kx, (N, Cin, H, W), dtype=jnp.float32)
    bound = 1.0 / np.sqrt(Cin * k * k)
    weight = jax.random.uniform(kw, (Cout, Cin, k, k), dtype=jnp.float32,
                                minval=-bound, maxval=bound)
    gamma = jnp.linspace(0.5, 1.5, Cout, dtype=jnp.float32)
    beta = jnp.linspace(-0.25, 0.25, Cout, dtype=jnp.float32)

    out = conv2d_batchnorm(x, weight, gamma, beta, stride=stride,
                           padding=padding, dilation=dilation, eps=eps)
    out = jax.block_until_ready(out)

    ref = _reference(x, weight, gamma, beta, stride=stride, padding=padding,
                     dilation=dilation, eps=eps)
    # Default MXU precision (bf16 passes) vs full-f32 reference: tolerance
    # loosened from 1e-3 to 2e-2 per perf review.
    np.testing.assert_allclose(np.asarray(out), np.asarray(ref),
                               rtol=2e-2, atol=2e-2)


if __name__ == "__main__":
    key = jax.random.PRNGKey(0)
    k1, k2 = jax.random.split(key)

    # conv2DBatchNorm(in_channels=4, n_filters=8, k_size=3, stride=1,
    #                 padding=1, dilation=1, with_bn=True)
    _run_case(k1, N=2, Cin=4, H=16, W=16, Cout=8, k=3,
              stride=1, padding=1, dilation=1, eps=1e-5)

    # Awkward shapes: strided + dilated conv, Cout not a multiple of 8,
    # M not a multiple of 8 (exercises the M/Cout padding paths).
    _run_case(k2, N=1, Cin=3, H=13, W=13, Cout=5, k=3,
              stride=2, padding=2, dilation=2, eps=1e-5)

    print("KERNEL_OK")
</pallas_src>

<mosaic_0001>
module attributes {stable_mosaic.version = 11 : i64} {
  func.func @_fused_conv_bn_kernel(%arg0: i32, %arg1: i32, %arg2: memref<512x36xf32, #tpu.memory_space<vmem>>, %arg3: memref<36x128xf32, #tpu.memory_space<vmem>>, %arg4: memref<1x128xf32, #tpu.memory_space<vmem>>, %arg5: memref<1x128xf32, #tpu.memory_space<vmem>>, %arg6: memref<512x128xf32, #tpu.memory_space<vmem>>, %arg7: memref<1x128xf32, #tpu.memory_space<vmem>>, %arg8: memref<1x128xf32, #tpu.memory_space<vmem>>) attributes {dimension_semantics = [#tpu.dimension_semantics<arbitrary>, #tpu.dimension_semantics<arbitrary>], iteration_bounds = array<i64: 2, 1>, scalar_prefetch = 0 : i64, scratch_operands = 2 : i64, tpu.core_type = #tpu.core_type<tc>, window_params = [{transform_indices = @transform_0, window_bounds = array<i64: 512, 36>}, {pipeline_mode = #tpu.pipeline_mode<synchronous>, transform_indices = @transform_1, window_bounds = array<i64: 36, 128>}, {pipeline_mode = #tpu.pipeline_mode<synchronous>, transform_indices = @transform_2, window_bounds = array<i64: 1, 128>}, {pipeline_mode = #tpu.pipeline_mode<synchronous>, transform_indices = @transform_3, window_bounds = array<i64: 1, 128>}, {transform_indices = @transform_4, window_bounds = array<i64: 512, 128>}]} {
    %c0 = arith.constant 0 : index
    %c0_0 = arith.constant 0 : index
    %0 = vector.load %arg2[%c0, %c0_0] : memref<512x36xf32, #tpu.memory_space<vmem>>, vector<512x36xf32>
    %c0_1 = arith.constant 0 : index
    %c0_2 = arith.constant 0 : index
    %1 = vector.load %arg3[%c0_1, %c0_2] : memref<36x128xf32, #tpu.memory_space<vmem>>, vector<36x128xf32>
    %cst = arith.constant dense<0.000000e+00> : vector<512x128xf32>
    %2 = tpu.matmul %0, %1, %cst {dimension_numbers = #tpu.dot_dimension_numbers<[1], [0], [0], [1], [0, 0, 1, 1], [], []>} : vector<512x36xf32>, vector<36x128xf32>, vector<512x128xf32> -> vector<512x128xf32>
    %c0_i32 = arith.constant 0 : i32
    %3 = arith.cmpi eq, %arg0, %c0_i32 : i32
    %c0_i32_3 = arith.constant 0 : i32
    %4 = arith.cmpi eq, %arg1, %c0_i32_3 : i32
    %5 = arith.andi %3, %4 : i1
    %6 = arith.extui %5 : i1 to i32
    %c0_i32_4 = arith.constant 0 : i32
    %7 = arith.cmpi ne, %6, %c0_i32_4 : i32
    scf.if %7 {
      %cst_8 = arith.constant 0.000000e+00 : f32
      %14 = vector.broadcast %cst_8 : f32 to vector<1x128xf32>
      %c0_9 = arith.constant 0 : index
      %c0_10 = arith.constant 0 : index
      %15 = vector.load %arg7[%c0_9, %c0_10] : memref<1x128xf32, #tpu.memory_space<vmem>>, vector<1x128xf32>
      tpu.vector_store %arg7[%c0_9, %c0_10], %14 {strides = array<i32>} : memref<1x128xf32, #tpu.memory_space<vmem>>, vector<1x128xf32>,
      %cst_11 = arith.constant 0.000000e+00 : f32
      %16 = vector.broadcast %cst_11 : f32 to vector<1x128xf32>
      %c0_12 = arith.constant 0 : index
      %c0_13 = arith.constant 0 : index
      %17 = vector.load %arg8[%c0_12, %c0_13] : memref<1x128xf32, #tpu.memory_space<vmem>>, vector<1x128xf32>
      tpu.vector_store %arg8[%c0_12, %c0_13], %16 {strides = array<i32>} : memref<1x128xf32, #tpu.memory_space<vmem>>, vector<1x128xf32>,
    } else {
    }
    %c0_i32_5 = arith.constant 0 : i32
    %8 = arith.cmpi eq, %arg0, %c0_i32_5 : i32
    %9 = arith.extui %8 : i1 to i32
    %c0_i32_6 = arith.constant 0 : i32
    %10 = arith.cmpi ne, %9, %c0_i32_6 : i32
    scf.if %10 {
      %c0_8 = arith.constant 0 : index
      %c0_9 = arith.constant 0 : index
      %14 = vector.load %arg7[%c0_8, %c0_9] : memref<1x128xf32, #tpu.memory_space<vmem>>, vector<1x128xf32>
      %cst_10 = arith.constant dense<0.000000e+00> : vector<128xf32>
      %15 = vector.multi_reduction <add>, %2, %cst_10 [0] : vector<512x128xf32> to vector<128xf32>
      %16 = vector.shape_cast %15 : vector<128xf32> to vector<1x128xf32>
      %17 = arith.addf %14, %16 : vector<1x128xf32>
      %c0_11 = arith.constant 0 : index
      %c0_12 = arith.constant 0 : index
      %18 = vector.load %arg7[%c0_11, %c0_12] : memref<1x128xf32, #tpu.memory_space<vmem>>, vector<1x128xf32>
      tpu.vector_store %arg7[%c0_11, %c0_12], %17 {strides = array<i32>} : memref<1x128xf32, #tpu.memory_space<vmem>>, vector<1x128xf32>,
      %c0_13 = arith.constant 0 : index
      %c0_14 = arith.constant 0 : index
      %19 = vector.load %arg8[%c0_13, %c0_14] : memref<1x128xf32, #tpu.memory_space<vmem>>, vector<1x128xf32>
      %20 = arith.mulf %2, %2 : vector<512x128xf32>
      %cst_15 = arith.constant dense<0.000000e+00> : vector<128xf32>
      %21 = vector.multi_reduction <add>, %20, %cst_15 [0] : vector<512x128xf32> to vector<128xf32>
      %22 = vector.shape_cast %21 : vector<128xf32> to vector<1x128xf32>
      %23 = arith.addf %19, %22 : vector<1x128xf32>
      %c0_16 = arith.constant 0 : index
      %c0_17 = arith.constant 0 : index
      %24 = vector.load %arg8[%c0_16, %c0_17] : memref<1x128xf32, #tpu.memory_space<vmem>>, vector<1x128xf32>
      tpu.vector_store %arg8[%c0_16, %c0_17], %23 {strides = array<i32>} : memref<1x128xf32, #tpu.memory_space<vmem>>, vector<1x128xf32>,
    } else {
    }
    %c1_i32 = arith.constant 1 : i32
    %11 = arith.cmpi eq, %arg0, %c1_i32 : i32
    %12 = arith.extui %11 : i1 to i32
    %c0_i32_7 = arith.constant 0 : i32
    %13 = arith.cmpi ne, %12, %c0_i32_7 : i32
    scf.if %13 {
      %c0_8 = arith.constant 0 : index
      %c0_9 = arith.constant 0 : index
      %14 = vector.load %arg7[%c0_8, %c0_9] : memref<1x128xf32, #tpu.memory_space<vmem>>, vector<1x128xf32>
      %cst_10 = arith.constant 0.001953125 : f32
      %15 = vector.broadcast %cst_10 : f32 to vector<1x128xf32>
      %16 = arith.mulf %14, %15 : vector<1x128xf32>
      %c0_11 = arith.constant 0 : index
      %c0_12 = arith.constant 0 : index
      %17 = vector.load %arg8[%c0_11, %c0_12] : memref<1x128xf32, #tpu.memory_space<vmem>>, vector<1x128xf32>
      %cst_13 = arith.constant 0.001953125 : f32
      %18 = vector.broadcast %cst_13 : f32 to vector<1x128xf32>
      %19 = arith.mulf %17, %18 : vector<1x128xf32>
      %20 = arith.mulf %16, %16 : vector<1x128xf32>
      %21 = arith.subf %19, %20 : vector<1x128xf32>
      %cst_14 = arith.constant 9.99999974E-6 : f32
      %22 = vector.broadcast %cst_14 : f32 to vector<1x128xf32>
      %23 = arith.addf %21, %22 : vector<1x128xf32>
      %24 = math.rsqrt %23 : vector<1x128xf32>
      %25 = vector.broadcast %16 : vector<1x128xf32> to vector<512x128xf32>
      %26 = arith.subf %2, %25 : vector<512x128xf32>
      %27 = vector.broadcast %24 : vector<1x128xf32> to vector<512x128xf32>
      %28 = arith.mulf %26, %27 : vector<512x128xf32>
      %c0_15 = arith.constant 0 : index
      %c0_16 = arith.constant 0 : index
      %29 = vector.load %arg4[%c0_15, %c0_16] : memref<1x128xf32, #tpu.memory_space<vmem>>, vector<1x128xf32>
      %30 = vector.broadcast %29 : vector<1x128xf32> to vector<512x128xf32>
      %31 = arith.mulf %28, %30 : vector<512x128xf32>
      %c0_17 = arith.constant 0 : index
      %c0_18 = arith.constant 0 : index
      %32 = vector.load %arg5[%c0_17, %c0_18] : memref<1x128xf32, #tpu.memory_space<vmem>>, vector<1x128xf32>
      %33 = vector.broadcast %32 : vector<1x128xf32> to vector<512x128xf32>
      %34 = arith.addf %31, %33 : vector<512x128xf32>
      %c0_19 = arith.constant 0 : index
      %c0_20 = arith.constant 0 : index
      %35 = vector.load %arg6[%c0_19, %c0_20] : memref<512x128xf32, #tpu.memory_space<vmem>>, vector<512x128xf32>
      tpu.vector_store %arg6[%c0_19, %c0_20], %34 {strides = array<i32>} : memref<512x128xf32, #tpu.memory_space<vmem>>, vector<512x128xf32>,
    } else {
    }
    return
  }
  func.func @transform_0(%arg0: i32, %arg1: i32) -> (i32, i32) {
    %c0_i32 = arith.constant 0 : i32
    %c0_i32_0 = arith.constant 0 : i32
    return %arg1, %c0_i32 : i32, i32
  }
  func.func @transform_1(%arg0: i32, %arg1: i32) -> (i32, i32) {
    %c0_i32 = arith.constant 0 : i32
    %c0_i32_0 = arith.constant 0 : i32
    %c0_i32_1 = arith.constant 0 : i32
    return %c0_i32, %c0_i32_0 : i32, i32
  }
  func.func @transform_2(%arg0: i32, %arg1: i32) -> (i32, i32) {
    %c0_i32 = arith.constant 0 : i32
    %c0_i32_0 = arith.constant 0 : i32
    %c0_i32_1 = arith.constant 0 : i32
    return %c0_i32, %c0_i32_0 : i32, i32
  }
  func.func @transform_3(%arg0: i32, %arg1: i32) -> (i32, i32) {
    %c0_i32 = arith.constant 0 : i32
    %c0_i32_0 = arith.constant 0 : i32
    %c0_i32_1 = arith.constant 0 : i32
    return %c0_i32, %c0_i32_0 : i32, i32
  }
  func.func @transform_4(%arg0: i32, %arg1: i32) -> (i32, i32) {
    %0 = arith.muli %arg0, %arg1 : i32
    %c0_i32 = arith.constant 0 : i32
    %c0_i32_0 = arith.constant 0 : i32
    return %0, %c0_i32 : i32, i32
  }
}

</mosaic_0001>

<bundles_post_ra>
// kernel: tpu_custom_call.1
= control target key start
LH: loop header
LB: loop body
LE: loop exit
PB: predicated region body
PF: predicated region fallthrough
CT: control target
= control target key end

     0   :  { %9 = vsyncpa [#allocation5], 0  ;;  %s3049_s0 = inlined_call_operand.vmem [shape: f32[512,36], index: 0, kind: input, shape index: {}]   ;;  %s3050_s1 = inlined_call_operand.vmem [shape: f32[36,128], index: 1, kind: input, shape index: {}]   ;;  %s3051_s2 = inlined_call_operand.vmem [shape: f32[1,128], index: 2, kind: input, shape index: {}]   ;;  %s3052_s3 = inlined_call_operand.vmem [shape: f32[1,128], index: 3, kind: input, shape index: {}]   ;;  %s3053_s4 = inlined_call_operand.hbm [shape: f32[512,128], index: 4, kind: output, shape index: {}]  }
   0x1   :  { %11 = vsyncpa [#allocation5 + $0x1], 0  ;;  %s1923_s15 = smov 0   ;;  %s1925_s16 = smov 0  }
   0x2   :  { %s1927_s17 = smov 0  }
   0x3 LB: > { %s1530_s18 = sadd.s32 4294967295, %s1892_s17   ;;  %s1531_s19 = sadd.s32 4294967294, %s1892_s17   ;;  %s1892_s17 = sphi %s1927_s17, %s17_s17   ;;  %s1888_s16 = sphi %s1925_s16, %s3209_s16   ;;  %s1884_s15 = sphi %s1923_s15, %s3208_s15  }
   0x4   : > { %s29_s20 = sadd.s32 1, %s1888_s16  ;;  %p1534_p0 = scmp.ge.s32.totalorder %s1892_s17, 1 }
   0x5   : > { %p31_p1 = scmp.ge.s32.totalorder %s29_s20, 2  ;;  %p180_p2 = scmp.lt.s32.totalorder %s1892_s17, 3 }
   0x7   : > { %s3211_s20 = smov (%p31_p1, %s29_s20), 0  ;;  %p181_p3 = pnand %p1534_p0, %p180_p2 }
   0x9   : > { %184 = sbr.rel (%p181_p3) target bundleno = 579 (0x243), region = 36 }
  0x10   : > { %v278_v0 = vld [vmem:[%s3050_s1] sm:$0xff]  ;;  %v279_v1 = vld [vmem:[%s3050_s1 + $0x8] sm:$0xff]  ;;  %v280_v2 = vld [vmem:[%s3050_s1 + $0x10] sm:$0xff]  ;;  %vm283_vm0 = vcmask 293888   ;;  %vm476_vm1 = vcmask 1043456   ;;  %p865_p4 = scmp.eq.s32.totalorder %s1884_s15, 0 }
  0x11   : > { %v1785_v3 = vpack.c.bf16 %v279_v1, %v278_v0  ;;  %v281_v4 = vld [vmem:[%s3050_s1 + $0x18] sm:$0xff]  ;;  %v214_v5 = vld [vmem:[%s3049_s0] sm:$0xff]  ;;  %v215_v9 = vld [vmem:[%s3049_s0 + $0x8] sm:$0xff] }
  0x12   : > { %v1789_v6 = vpack.c.bf16 %v281_v4, %v280_v2  ;;  %1689 = vmatprep.mubr.msk.f32.mxu0 %vm283_vm0, %v214_v5  ;;  %v246_v7 = vld [vmem:[%s3049_s0 + $0x100] sm:$0xff]  ;;  %v247_v10 = vld [vmem:[%s3049_s0 + $0x108] sm:$0xff]  ;;  %v216_v11 = vld [vmem:[%s3049_s0 + $0x10] sm:$0xff] }
  0x13   : > { %1786 = vmatprep.subr.bf16.mxu0 %v1785_v3  ;;  %1793 = vmatprep.subr.bf16.mxu1 %v1785_v3  ;;  %v282_v8 = vld [vmem:[%s3050_s1 + $0x20] sm:$0xf]  ;;  %v248_v12 = vld [vmem:[%s3049_s0 + $0x110] sm:$0xff]  ;;  %v217_v13 = vld [vmem:[%s3049_s0 + $0x18] sm:$0xff] }
  0x14   : > { %1788 = vmatpush3.bf16.msra.mxu0 %v1785_v3  ;;  %1796 = vmatpush3.bf16.msra.mxu1 %v1785_v3  ;;  %v249_v14 = vld [vmem:[%s3049_s0 + $0x118] sm:$0xff]  ;;  %v218_v15 = vld [vmem:[%s3049_s0 + $0x20] sm:$0xff]  ;;  %v219_v17 = vld [vmem:[%s3049_s0 + $0x28] sm:$0xff] }
  0x15   : > { %1790 = vmatprep.subr.bf16.mxu0 %v1789_v6  ;;  %1794 = vmatprep.subr.bf16.mxu1 %v1789_v6  ;;  %v250_v16 = vld [vmem:[%s3049_s0 + $0x120] sm:$0xff]  ;;  %v251_v18 = vld [vmem:[%s3049_s0 + $0x128] sm:$0xff]  ;;  %v220_v19 = vld [vmem:[%s3049_s0 + $0x30] sm:$0xff] }
  0x16   : > { %1737 = vmatprep.mubr.msk.f32.mxu1 %vm283_vm0, %v246_v7  ;;  %v252_v20 = vld [vmem:[%s3049_s0 + $0x130] sm:$0xff]  ;;  %v221_v21 = vld [vmem:[%s3049_s0 + $0x38] sm:$0xff]  ;;  %v222_v23 = vld [vmem:[%s3049_s0 + $0x40] sm:$0xff] }
  0x17   : > { %v253_v22 = vld [vmem:[%s3049_s0 + $0x138] sm:$0xff]  ;;  %v254_v24 = vld [vmem:[%s3049_s0 + $0x140] sm:$0xff]  ;;  %v223_v25 = vld [vmem:[%s3049_s0 + $0x48] sm:$0xff] }
  0x18   : > { %1792 = vmatpush3.bf16.msra.mxu0 %v1789_v6  ;;  %1797 = vmatpush3.bf16.msra.mxu1 %v1789_v6  ;;  %v255_v26 = vld [vmem:[%s3049_s0 + $0x148] sm:$0xff]  ;;  %v224_v27 = vld [vmem:[%s3049_s0 + $0x50] sm:$0xff]  ;;  %v225_v29 = vld [vmem:[%s3049_s0 + $0x58] sm:$0xff] }
  0x19   : > { %1687 = vmatprep.subr.msk.mxu0 %vm476_vm1, %v282_v8  ;;  %1795 = vmatprep.subr.msk.mxu1 %vm476_vm1, %v282_v8  ;;  %v256_v28 = vld [vmem:[%s3049_s0 + $0x150] sm:$0xff]  ;;  %v257_v30 = vld [vmem:[%s3049_s0 + $0x158] sm:$0xff]  ;;  %v226_v31 = vld [vmem:[%s3049_s0 + $0x60] sm:$0xff] }
  0x1a   : > { %v258_v32 = vld [vmem:[%s3049_s0 + $0x160] sm:$0xff]  ;;  %v227_v33 = vld [vmem:[%s3049_s0 + $0x68] sm:$0xff]  ;;  %v228_v35 = vld [vmem:[%s3049_s0 + $0x70] sm:$0xff] }
  0x1b   : > { %v259_v34 = vld [vmem:[%s3049_s0 + $0x168] sm:$0xff]  ;;  %v260_v36 = vld [vmem:[%s3049_s0 + $0x170] sm:$0xff]  ;;  %v229_v37 = vld [vmem:[%s3049_s0 + $0x78] sm:$0xff] }
  0x1c   : > { %1688 = vmatpush3.msk.msra.mxu0 %vm476_vm1, %v282_v8  ;;  %1798 = vmatpush3.msk.msra.mxu1 %vm476_vm1, %v282_v8  ;;  %v261_v38 = vld [vmem:[%s3049_s0 + $0x178] sm:$0xff]  ;;  %v230_v39 = vld [vmem:[%s3049_s0 + $0x80] sm:$0xff]  ;;  %v231_v41 = vld [vmem:[%s3049_s0 + $0x88] sm:$0xff] }
  0x1d   : > { %1690 = vmatmul.mubr.msk.f32.vlgmr.msra.gmra.mrb[0].mxu0 %vm283_vm0, %v215_v9  ;;  %1738 = vmatmul.mubr.msk.f32.vlgmr.msra.gmra.mrb[0].mxu1 %vm283_vm0, %v247_v10  ;;  %v262_v40 = vld [vmem:[%s3049_s0 + $0x180] sm:$0xff]  ;;  %v263_v42 = vld [vmem:[%s3049_s0 + $0x188] sm:$0xff]  ;;  %v232_v43 = vld [vmem:[%s3049_s0 + $0x90] sm:$0xff] }
  0x1e   : > { %1692 = vmatprep.mubr.msk.f32.mxu0 %vm283_vm0, %v216_v11  ;;  %1740 = vmatprep.mubr.msk.f32.mxu1 %vm283_vm0, %v248_v12  ;;  %v264_v44 = vld [vmem:[%s3049_s0 + $0x190] sm:$0xff]  ;;  %v233_v45 = vld [vmem:[%s3049_s0 + $0x98] sm:$0xff]  ;;  %v234_v47 = vld [vmem:[%s3049_s0 + $0xa0] sm:$0xff] }
  0x1f   : > { %v265_v46 = vld [vmem:[%s3049_s0 + $0x198] sm:$0xff]  ;;  %v266_v48 = vld [vmem:[%s3049_s0 + $0x1a0] sm:$0xff]  ;;  %v235_v49 = vld [vmem:[%s3049_s0 + $0xa8] sm:$0xff] }
  0x20   : > { %v267_v50 = vld [vmem:[%s3049_s0 + $0x1a8] sm:$0xff]  ;;  %v236_v51 = vld [vmem:[%s3049_s0 + $0xb0] sm:$0xff]  ;;  %v237_v53 = vld [vmem:[%s3049_s0 + $0xb8] sm:$0xff] }
  0x21   : > { %1693 = vmatmul.mubr.msk.f32.gmra.mrb[2].mxu0 %vm283_vm0, %v217_v13  ;;  %1741 = vmatmul.mubr.msk.f32.gmra.mrb[2].mxu1 %vm283_vm0, %v249_v14  ;;  %v268_v52 = vld [vmem:[%s3049_s0 + $0x1b0] sm:$0xff]  ;;  %v269_v54 = vld [vmem:[%s3049_s0 + $0x1b8] sm:$0xff]  ;;  %v238_v55 = vld [vmem:[%s3049_s0 + $0xc0] sm:$0xff] }
  0x22   : > { %1695 = vmatprep.mubr.msk.f32.mxu0 %vm283_vm0, %v218_v15  ;;  %1743 = vmatprep.mubr.msk.f32.mxu1 %vm283_vm0, %v250_v16  ;;  %v270_v56 = vld [vmem:[%s3049_s0 + $0x1c0] sm:$0xff]  ;;  %v239_v57 = vld [vmem:[%s3049_s0 + $0xc8] sm:$0xff]  ;;  %v240_v59 = vld [vmem:[%s3049_s0 + $0xd0] sm:$0xff] }
  0x23   : > { %v271_v58 = vld [vmem:[%s3049_s0 + $0x1c8] sm:$0xff]  ;;  %v272_v60 = vld [vmem:[%s3049_s0 + $0x1d0] sm:$0xff]  ;;  %v241_v61 = vld [vmem:[%s3049_s0 + $0xd8] sm:$0xff] }
  0x24   : > { %v273_v62 = vld [vmem:[%s3049_s0 + $0x1d8] sm:$0xff]  ;;  %v242_v63 = vld [vmem:[%s3049_s0 + $0xe0] sm:$0xff]  ;;  %v243_v1 = vld [vmem:[%s3049_s0 + $0xe8] sm:$0xff] }
  0x25   : > { %1696 = vmatmul.mubr.msk.f32.gmra.mrb[4].mxu0 %vm283_vm0, %v219_v17  ;;  %1744 = vmatmul.mubr.msk.f32.gmra.mrb[4].mxu1 %vm283_vm0, %v251_v18  ;;  %v274_v0 = vld [vmem:[%s3049_s0 + $0x1e0] sm:$0xff]  ;;  %v275_v2 = vld [vmem:[%s3049_s0 + $0x1e8] sm:$0xff]  ;;  %v244_v3 = vld [vmem:[%s3049_s0 + $0xf0] sm:$0xff] }
  0x26   : > { %1698 = vmatprep.mubr.msk.f32.mxu0 %vm283_vm0, %v220_v19  ;;  %1746 = vmatprep.mubr.msk.f32.mxu1 %vm283_vm0, %v252_v20  ;;  %v276_v4 = vld [vmem:[%s3049_s0 + $0x1f0] sm:$0xff]  ;;  %v245_v5 = vld [vmem:[%s3049_s0 + $0xf8] sm:$0xff] }
  0x27   : > { %v277_v6 = vld [vmem:[%s3049_s0 + $0x1f8] sm:$0xff] }
  0x29   : > { %1699 = vmatmul.mubr.msk.f32.gmra.mrb[6].mxu0 %vm283_vm0, %v221_v21  ;;  %1747 = vmatmul.mubr.msk.f32.gmra.mrb[6].mxu1 %vm283_vm0, %v253_v22 }
  0x2a   : > { %1701 = vmatprep.mubr.msk.f32.mxu0 %vm283_vm0, %v222_v23  ;;  %1749 = vmatprep.mubr.msk.f32.mxu1 %vm283_vm0, %v254_v24 }
  0x2d   : > { %1702 = vmatmul.mubr.msk.f32.gmra.mrb[8].mxu0 %vm283_vm0, %v223_v25  ;;  %1750 = vmatmul.mubr.msk.f32.gmra.mrb[8].mxu1 %vm283_vm0, %v255_v26 }
  0x2e   : > { %1704 = vmatprep.mubr.msk.f32.mxu0 %vm283_vm0, %v224_v27  ;;  %1752 = vmatprep.mubr.msk.f32.mxu1 %vm283_vm0, %v256_v28 }
  0x31   : > { %1705 = vmatmul.mubr.msk.f32.gmra.mrb[10].mxu0 %vm283_vm0, %v225_v29  ;;  %1753 = vmatmul.mubr.msk.f32.gmra.mrb[10].mxu1 %vm283_vm0, %v257_v30 }
  0x32   : > { %1707 = vmatprep.mubr.msk.f32.mxu0 %vm283_vm0, %v226_v31  ;;  %1755 = vmatprep.mubr.msk.f32.mxu1 %vm283_vm0, %v258_v32 }
  0x35   : > { %1708 = vmatmul.mubr.msk.f32.gmra.mrb[12].mxu0 %vm283_vm0, %v227_v33  ;;  %1756 = vmatmul.mubr.msk.f32.gmra.mrb[12].mxu1 %vm283_vm0, %v259_v34 }
  0x36   : > { %1710 = vmatprep.mubr.msk.f32.mxu0 %vm283_vm0, %v228_v35  ;;  %1758 = vmatprep.mubr.msk.f32.mxu1 %vm283_vm0, %v260_v36 }
  0x39   : > { %1711 = vmatmul.mubr.msk.f32.gmra.mrb[14].mxu0 %vm283_vm0, %v229_v37  ;;  %1759 = vmatmul.mubr.msk.f32.gmra.mrb[14].mxu1 %vm283_vm0, %v261_v38 }
  0x3a   : > { %1713 = vmatprep.mubr.msk.f32.mxu0 %vm283_vm0, %v230_v39  ;;  %1761 = vmatprep.mubr.msk.f32.mxu1 %vm283_vm0, %v262_v40 }
  0x3d   : > { %1714 = vmatmul.mubr.msk.f32.gmra.mrb[16].mxu0 %vm283_vm0, %v231_v41  ;;  %1762 = vmatmul.mubr.msk.f32.gmra.mrb[16].mxu1 %vm283_vm0, %v263_v42 }
  0x3e   : > { %1716 = vmatprep.mubr.msk.f32.mxu0 %vm283_vm0, %v232_v43  ;;  %1764 = vmatprep.mubr.msk.f32.mxu1 %vm283_vm0, %v264_v44 }
  0x41   : > { %1717 = vmatmul.mubr.msk.f32.gmra.mrb[18].mxu0 %vm283_vm0, %v233_v45  ;;  %1765 = vmatmul.mubr.msk.f32.gmra.mrb[18].mxu1 %vm283_vm0, %v265_v46 }
  0x42   : > { %1719 = vmatprep.mubr.msk.f32.mxu0 %vm283_vm0, %v234_v47  ;;  %1767 = vmatprep.mubr.msk.f32.mxu1 %vm283_vm0, %v266_v48 }
  0x45   : > { %1720 = vmatmul.mubr.msk.f32.gmra.mrb[20].mxu0 %vm283_vm0, %v235_v49  ;;  %1768 = vmatmul.mubr.msk.f32.gmra.mrb[20].mxu1 %vm283_vm0, %v267_v50 }
  0x46   : > { %1722 = vmatprep.mubr.msk.f32.mxu0 %vm283_vm0, %v236_v51  ;;  %1770 = vmatprep.mubr.msk.f32.mxu1 %vm283_vm0, %v268_v52 }
  0x49   : > { %1723 = vmatmul.mubr.msk.f32.gmra.mrb[22].mxu0 %vm283_vm0, %v237_v53  ;;  %1771 = vmatmul.mubr.msk.f32.gmra.mrb[22].mxu1 %vm283_vm0, %v269_v54 }
  0x4a   : > { %1725 = vmatprep.mubr.msk.f32.mxu0 %vm283_vm0, %v238_v55  ;;  %1773 = vmatprep.mubr.msk.f32.mxu1 %vm283_vm0, %v270_v56 }
  0x4d   : > { %1726 = vmatmul.mubr.msk.f32.gmra.mrb[24].mxu0 %vm283_vm0, %v239_v57  ;;  %1774 = vmatmul.mubr.msk.f32.gmra.mrb[24].mxu1 %vm283_vm0, %v271_v58 }
  0x4e   : > { %1728 = vmatprep.mubr.msk.f32.mxu0 %vm283_vm0, %v240_v59  ;;  %1776 = vmatprep.mubr.msk.f32.mxu1 %vm283_vm0, %v272_v60 }
  0x51   : > { %1729 = vmatmul.mubr.msk.f32.gmra.mrb[26].mxu0 %vm283_vm0, %v241_v61  ;;  %1777 = vmatmul.mubr.msk.f32.gmra.mrb[26].mxu1 %vm283_vm0, %v273_v62 }
  0x52   : > { %1731 = vmatprep.mubr.msk.f32.mxu0 %vm283_vm0, %v242_v63  ;;  %1779 = vmatprep.mubr.msk.f32.mxu1 %vm283_vm0, %v274_v0 }
  0x55   : > { %1732 = vmatmul.mubr.msk.f32.gmra.mrb[28].mxu0 %vm283_vm0, %v243_v1  ;;  %1780 = vmatmul.mubr.msk.f32.gmra.mrb[28].mxu1 %vm283_vm0, %v275_v2 }
  0x56   : > { %1734 = vmatprep.mubr.msk.f32.mxu0 %vm283_vm0, %v244_v3  ;;  %1782 = vmatprep.mubr.msk.f32.mxu1 %vm283_vm0, %v276_v4 }
  0x59   : > { %1735 = vmatmul.mubr.msk.f32.gmra.mrb[30].mxu0 %vm283_vm0, %v245_v5  ;;  %1783 = vmatmul.mubr.msk.f32.gmra.mrb[30].mxu1 %vm283_vm0, %v277_v6 }
  0xf0   : > { %v2217_v7 = vpop.f32.mrb[0].mxu0  ;;  %v2219_v8 = vpop.f32.mrb[0].mxu1 }
  0xf1   : > { %3093 = vst [vmem:[#allocation7_spill] sm:$0xff] %v2217_v7  ;;  %v2221_v9 = vpop.f32.mrb[1].mxu0  ;;  %v2223_v10 = vpop.f32.mrb[1].mxu1 }
  0xf2   : > { %3094 = vst [vmem:[#allocation8_spill] sm:$0xff] %v2221_v9 }
  0xf4   : > { %v2225_v11 = vpop.f32.mrb[2].mxu0  ;;  %v2227_v12 = vpop.f32.mrb[2].mxu1 }
  0xf5   : > { %v2229_v13 = vpop.f32.mrb[3].mxu0  ;;  %v2231_v14 = vpop.f32.mrb[3].mxu1 }
  0xf6   : > { %3095 = vst [vmem:[#allocation9_spill] sm:$0xff] %v2229_v13 }
  0xf8   : > { %v2233_v15 = vpop.f32.mrb[4].mxu0  ;;  %v2235_v16 = vpop.f32.mrb[4].mxu1 }
  0xf9   : > { %v2237_v17 = vpop.f32.mrb[5].mxu0  ;;  %v2239_v18 = vpop.f32.mrb[5].mxu1 }
  0xfc   : > { %v2241_v19 = vpop.f32.mrb[6].mxu0  ;;  %v2243_v20 = vpop.f32.mrb[6].mxu1 }
  0xfd   : > { %v2245_v21 = vpop.f32.mrb[7].mxu0  ;;  %v2247_v22 = vpop.f32.mrb[7].mxu1 }
 0x100   : > { %v2249_v23 = vpop.f32.mrb[8].mxu0  ;;  %v2251_v24 = vpop.f32.mrb[8].mxu1 }
 0x101   : > { %3096 = vst [vmem:[#allocation10_spill] sm:$0xff] %v2251_v24  ;;  %v2253_v25 = vpop.f32.mrb[9].mxu0  ;;  %v2255_v26 = vpop.f32.mrb[9].mxu1 }
 0x104   : > { %v2257_v27 = vpop.f32.mrb[10].mxu0  ;;  %v2259_v28 = vpop.f32.mrb[10].mxu1 }
 0x105   : > { %3097 = vst [vmem:[#allocation11_spill] sm:$0xff] %v2259_v28  ;;  %v2261_v29 = vpop.f32.mrb[11].mxu0  ;;  %v2263_v30 = vpop.f32.mrb[11].mxu1 }
 0x106   : > { %3098 = vst [vmem:[#allocation12_spill] sm:$0xff] %v2263_v30 }
 0x108   : > { %v2265_v31 = vpop.f32.mrb[12].mxu0  ;;  %v2267_v32 = vpop.f32.mrb[12].mxu1 }
 0x109   : > { %3099 = vst [vmem:[#allocation13_spill] sm:$0xff] %v2267_v32  ;;  %v2269_v33 = vpop.f32.mrb[13].mxu0  ;;  %v2271_v34 = vpop.f32.mrb[13].mxu1 }
 0x10a   : > { %3100 = vst [vmem:[#allocation14_spill] sm:$0xff] %v2271_v34 }
 0x10c   : > { %v2273_v35 = vpop.f32.mrb[14].mxu0  ;;  %v2275_v36 = vpop.f32.mrb[14].mxu1 }
 0x10d   : > { %3101 = vst [vmem:[#allocation15_spill] sm:$0xff] %v2275_v36  ;;  %v2277_v37 = vpop.f32.mrb[15].mxu0  ;;  %v2279_v38 = vpop.f32.mrb[15].mxu1 }
 0x10e   : > { %3102 = vst [vmem:[#allocation16_spill] sm:$0xff] %v2279_v38 }
 0x110   : > { %v2281_v39 = vpop.f32.mrb[16].mxu0  ;;  %v2283_v40 = vpop.f32.mrb[16].mxu1 }
 0x111   : > { %3103 = vst [vmem:[#allocation17_spill] sm:$0xff] %v2283_v40  ;;  %v2285_v41 = vpop.f32.mrb[17].mxu0  ;;  %v2287_v42 = vpop.f32.mrb[17].mxu1 }
 0x112   : > { %3104 = vst [vmem:[#allocation18_spill] sm:$0xff] %v2287_v42 }
 0x114   : > { %v2289_v43 = vpop.f32.mrb[18].mxu0  ;;  %v2291_v44 = vpop.f32.mrb[18].mxu1 }
 0x115   : > { %3105 = vst [vmem:[#allocation19_spill] sm:$0xff] %v2291_v44  ;;  %v2293_v45 = vpop.f32.mrb[19].mxu0  ;;  %v2295_v46 = vpop.f32.mrb[19].mxu1 }
 0x116   : > { %3106 = vst [vmem:[#allocation20_spill] sm:$0xff] %v2295_v46 }
 0x118   : > { %v2297_v47 = vpop.f32.mrb[20].mxu0  ;;  %v2299_v48 = vpop.f32.mrb[20].mxu1 }
 0x119   : > { %3107 = vst [vmem:[#allocation21_spill] sm:$0xff] %v2299_v48  ;;  %v2301_v49 = vpop.f32.mrb[21].mxu0  ;;  %v2303_v50 = vpop.f32.mrb[21].mxu1 }
 0x11a   : > { %3108 = vst [vmem:[#allocation22_spill] sm:$0xff] %v2303_v50 }
 0x11c   : > { %v2305_v51 = vpop.f32.mrb[22].mxu0  ;;  %v2307_v52 = vpop.f32.mrb[22].mxu1 }
 0x11d   : > { %3109 = vst [vmem:[#allocation23_spill] sm:$0xff] %v2307_v52  ;;  %v2309_v53 = vpop.f32.mrb[23].mxu0  ;;  %v2311_v54 = vpop.f32.mrb[23].mxu1 }
 0x11e   : > { %3110 = vst [vmem:[#allocation24_spill] sm:$0xff] %v2311_v54 }
 0x120   : > { %v2313_v55 = vpop.f32.mrb[24].mxu0  ;;  %v2315_v56 = vpop.f32.mrb[24].mxu1 }
 0x121   : > { %3111 = vst [vmem:[#allocation25_spill] sm:$0xff] %v2315_v56  ;;  %v2317_v57 = vpop.f32.mrb[25].mxu0  ;;  %v2319_v58 = vpop.f32.mrb[25].mxu1 }
 0x122   : > { %3112 = vst [vmem:[#allocation26_spill] sm:$0xff] %v2319_v58 }
 0x124   : > { %v2321_v59 = vpop.f32.mrb[26].mxu0  ;;  %v2323_v60 = vpop.f32.mrb[26].mxu1 }
 0x125   : > { %3113 = vst [vmem:[#allocation27_spill] sm:$0xff] %v2323_v60  ;;  %v2325_v61 = vpop.f32.mrb[27].mxu0  ;;  %v2327_v62 = vpop.f32.mrb[27].mxu1  ;;  %v1894_v60 = vmov (%p865_p4), 0.0  }
 0x126   : > { %3114 = vst [vmem:[#allocation28_spill] sm:$0xff] %v2327_v62  ;;  %871 = vst [vmem:[#allocation2] sm:$0x1] (%p865_p4), %v1894_v60 }
 0x127   : > { %872 = vst [vmem:[#allocation3] sm:$0x1] (%p865_p4), %v1894_v60 }
 0x128   : > { %v2329_v63 = vpop.f32.mrb[28].mxu0  ;;  %v2331_v0 = vpop.f32.mrb[28].mxu1  ;;  %870 = sbr.rel (!%p865_p4) target bundleno = 303 (0x12f), region = 40 }
 0x129   : > { %3115 = vst [vmem:[#allocation29_spill] sm:$0xff] %v2331_v0  ;;  %v2333_v1 = vpop.f32.mrb[29].mxu0  ;;  %v2335_v2 = vpop.f32.mrb[29].mxu1 }
 0x12a   : > { %3116 = vst [vmem:[#allocation30_spill] sm:$0xff] %v2335_v2 }
 0x12c   : > { %v2337_v3 = vpop.f32.mrb[30].mxu0  ;;  %v2339_v4 = vpop.f32.mrb[30].mxu1 }
 0x12d   : > { %3117 = vst [vmem:[#allocation31_spill] sm:$0xff] %v2339_v4  ;;  %v2341_v5 = vpop.f32.mrb[31].mxu0  ;;  %v2343_v6 = vpop.f32.mrb[31].mxu1 }
 0x12e   : > { %3118 = vst [vmem:[#allocation32_spill] sm:$0xff] %v2343_v6 }
 0x12f PF: > { %p1601_p5 = scmp.ne.s32.totalorder %s1884_s15, 0 }
 0x130   : > { %v877_v0 = vadd.f32 (!%p1601_p5), %v2217_v7, %v2221_v9  ;;  %v949_v52 = vmul.f32 (!%p1601_p5), %v2221_v9, %v2221_v9  ;;  %v950_v54 = vmul.f32 (!%p1601_p5), %v2217_v7, %v2217_v7 }
 0x131   : > { %875 = sbr.rel (%p1601_p5) target bundleno = 457 (0x1c9), region = 44 }
 0x132   : > { %v878_v2 = vadd.f32 (!%p1601_p5), %v877_v0, %v2229_v13 }
 0x134   : > { %v879_v4 = vadd.f32 (!%p1601_p5), %v2225_v11, %v878_v2  ;;  %v951_v2 = vmul.f32 (!%p1601_p5), %v2229_v13, %v2229_v13 }
 0x136   : > { %v880_v62 = vadd.f32 (!%p1601_p5), %v879_v4, %v2237_v17 }
 0x138   : > { %v881_v6 = vadd.f32 %v2233_v15, %v880_v62  ;;  %v952_v62 = vmul.f32 %v2225_v11, %v2225_v11 }
 0x13a   : > { %v882_v56 = vadd.f32 %v881_v6, %v2245_v21  ;;  %v1013_v6 = vadd.f32 %v950_v54, %v949_v52  ;;  %v956_v54 = vmul.f32 %v2241_v19, %v2241_v19 }
 0x13c   : > { %v883_v58 = vadd.f32 %v2241_v19, %v882_v56  ;;  %v1014_v9 = vadd.f32 %v1013_v6, %v951_v2  ;;  %v957_v6 = vmul.f32 %v2253_v25, %v2253_v25 }
 0x13e   : > { %v884_v60 = vadd.f32 %v883_v58, %v2253_v25  ;;  %v953_v58 = vmul.f32 %v2237_v17, %v2237_v17  ;;  %v1015_v7 = vadd.f32 %v1014_v9, %v952_v62 }
 0x140   : > { %v885_v0 = vadd.f32 %v2249_v23, %v884_v60  ;;  %v954_v60 = vmul.f32 %v2233_v15, %v2233_v15  ;;  %v1016_v50 = vadd.f32 %v1015_v7, %v953_v58 }
 0x142   : > { %v886_v4 = vadd.f32 %v885_v0, %v2261_v29  ;;  %v955_v0 = vmul.f32 %v2245_v21, %v2245_v21 }
 0x144   : > { %v887_v56 = vadd.f32 %v2257_v27, %v886_v4  ;;  %v1017_v4 = vadd.f32 %v1016_v50, %v954_v60  ;;  %v960_v60 = vmul.f32 %v2257_v27, %v2257_v27 }
 0x146   : > { %v888_v48 = vadd.f32 %v887_v56, %v2269_v33  ;;  %v1018_v56 = vadd.f32 %v1017_v4, %v955_v0  ;;  %v961_v4 = vmul.f32 %v2269_v33, %v2269_v33 }
 0x148   : > { %v889_v13 = vadd.f32 %v2265_v31, %v888_v48  ;;  %v958_v48 = vmul.f32 %v2249_v23, %v2249_v23  ;;  %v1019_v62 = vadd.f32 %v1018_v56, %v956_v54  ;;  %v962_v56 = vmul.f32 %v2265_v31, %v2265_v31 }
 0x14a   : > { %v890_v52 = vadd.f32 %v889_v13, %v2277_v37  ;;  %v959_v13 = vmul.f32 %v2261_v29, %v2261_v29  ;;  %v1020_v58 = vadd.f32 %v1019_v62, %v957_v6  ;;  %v963_v62 = vmul.f32 %v2277_v37, %v2277_v37 }
 0x14c   : > { %v891_v2 = vadd.f32 %v2273_v35, %v890_v52  ;;  %v1021_v52 = vadd.f32 %v1020_v58, %v958_v48  ;;  %v964_v58 = vmul.f32 %v2273_v35, %v2273_v35 }
 0x14e   : > { %v892_v9 = vadd.f32 %v891_v2, %v2285_v41  ;;  %v1022_v2 = vadd.f32 %v1021_v52, %v959_v13  ;;  %v965_v52 = vmul.f32 %v2285_v41, %v2285_v41 }
 0x150   : > { %v893_v7 = vadd.f32 %v2281_v39, %v892_v9  ;;  %v1023_v9 = vadd.f32 %v1022_v2, %v960_v60  ;;  %v966_v2 = vmul.f32 %v2281_v39, %v2281_v39 }
 0x152   : > { %v894_v50 = vadd.f32 %v893_v7, %v2293_v45  ;;  %v1024_v7 = vadd.f32 %v1023_v9, %v961_v4  ;;  %v967_v9 = vmul.f32 %v2293_v45, %v2293_v45 }
 0x154   : > { %v895_v0 = vadd.f32 %v2289_v43, %v894_v50  ;;  %v1025_v50 = vadd.f32 %v1024_v7, %v962_v56  ;;  %v968_v7 = vmul.f32 %v2289_v43, %v2289_v43 }
 0x156   : > { %v896_v54 = vadd.f32 %v895_v0, %v2301_v49  ;;  %v1026_v0 = vadd.f32 %v1025_v50, %v963_v62  ;;  %v969_v50 = vmul.f32 %v2301_v49, %v2301_v49 }
 0x158   : > { %v897_v6 = vadd.f32 %v2297_v47, %v896_v54  ;;  %v1027_v54 = vadd.f32 %v1026_v0, %v964_v58  ;;  %v970_v0 = vmul.f32 %v2297_v47, %v2297_v47 }
 0x15a   : > { %v898_v48 = vadd.f32 %v897_v6, %v2309_v53  ;;  %v1028_v6 = vadd.f32 %v1027_v54, %v965_v52  ;;  %v971_v54 = vmul.f32 %v2309_v53, %v2309_v53 }
 0x15c   : > { %v899_v13 = vadd.f32 %v2305_v51, %v898_v48  ;;  %v1029_v48 = vadd.f32 %v1028_v6, %v966_v2  ;;  %v972_v6 = vmul.f32 %v2305_v51, %v2305_v51 }
 0x15e   : > { %v900_v60 = vadd.f32 %v899_v13, %v2317_v57  ;;  %v1030_v13 = vadd.f32 %v1029_v48, %v967_v9  ;;  %v973_v48 = vmul.f32 %v2317_v57, %v2317_v57 }
 0x160   : > { %v901_v4 = vadd.f32 %v2313_v55, %v900_v60  ;;  %v1031_v60 = vadd.f32 %v1030_v13, %v968_v7  ;;  %v974_v13 = vmul.f32 %v2313_v55, %v2313_v55 }
 0x162   : > { %v902_v56 = vadd.f32 %v901_v4, %v2325_v61  ;;  %v1032_v4 = vadd.f32 %v1031_v60, %v969_v50  ;;  %v975_v60 = vmul.f32 %v2325_v61, %v2325_v61 }
 0x164   : > { %v903_v62 = vadd.f32 %v2321_v59, %v902_v56  ;;  %v1033_v56 = vadd.f32 %v1032_v4, %v970_v0  ;;  %v976_v4 = vmul.f32 %v2321_v59, %v2321_v59 }
 0x166   : > { %v904_v58 = vadd.f32 %v903_v62, %v2333_v1  ;;  %v1034_v62 = vadd.f32 %v1033_v56, %v971_v54  ;;  %v977_v56 = vmul.f32 %v2333_v1, %v2333_v1 }
 0x168   : > { %v905_v52 = vadd.f32 %v2329_v63, %v904_v58  ;;  %v1035_v58 = vadd.f32 %v1034_v62, %v972_v6  ;;  %v978_v62 = vmul.f32 %v2329_v63, %v2329_v63 }
 0x16a   : > { %v906_v2 = vadd.f32 %v905_v52, %v2341_v5  ;;  %v1036_v52 = vadd.f32 %v1035_v58, %v973_v48  ;;  %v979_v58 = vmul.f32 %v2341_v5, %v2341_v5 }
 0x16c   : > { %v907_v9 = vadd.f32 %v2337_v3, %v906_v2  ;;  %v1037_v2 = vadd.f32 %v1036_v52, %v974_v13  ;;  %v980_v52 = vmul.f32 %v2337_v3, %v2337_v3 }
 0x16e   : > { %v908_v7 = vadd.f32 %v907_v9, %v2223_v10  ;;  %v1038_v9 = vadd.f32 %v1037_v2, %v975_v60  ;;  %v981_v2 = vmul.f32 %v2223_v10, %v2223_v10 }
 0x170   : > { %v909_v50 = vadd.f32 %v2219_v8, %v908_v7  ;;  %v1039_v7 = vadd.f32 %v1038_v9, %v976_v4  ;;  %v982_v9 = vmul.f32 %v2219_v8, %v2219_v8 }
 0x172   : > { %v910_v0 = vadd.f32 %v909_v50, %v2231_v14  ;;  %v1040_v50 = vadd.f32 %v1039_v7, %v977_v56  ;;  %v983_v7 = vmul.f32 %v2231_v14, %v2231_v14 }
 0x174   : > { %v911_v54 = vadd.f32 %v2227_v12, %v910_v0  ;;  %v1041_v0 = vadd.f32 %v1040_v50, %v978_v62  ;;  %v984_v50 = vmul.f32 %v2227_v12, %v2227_v12 }
 0x176   : > { %v912_v6 = vadd.f32 %v911_v54, %v2239_v18  ;;  %v1042_v54 = vadd.f32 %v1041_v0, %v979_v58  ;;  %v985_v0 = vmul.f32 %v2239_v18, %v2239_v18 }
 0x178   : > { %v913_v48 = vadd.f32 %v2235_v16, %v912_v6  ;;  %v1043_v6 = vadd.f32 %v1042_v54, %v980_v52  ;;  %v986_v54 = vmul.f32 %v2235_v16, %v2235_v16 }
 0x17a   : > { %v914_v13 = vadd.f32 %v913_v48, %v2247_v22  ;;  %v1044_v48 = vadd.f32 %v1043_v6, %v981_v2  ;;  %v987_v6 = vmul.f32 %v2247_v22, %v2247_v22 }
 0x17c   : > { %v915_v60 = vadd.f32 %v2243_v20, %v914_v13  ;;  %v1045_v13 = vadd.f32 %v1044_v48, %v982_v9  ;;  %v988_v48 = vmul.f32 %v2243_v20, %v2243_v20 }
 0x17e   : > { %v916_v4 = vadd.f32 %v915_v60, %v2255_v26  ;;  %v1046_v60 = vadd.f32 %v1045_v13, %v983_v7  ;;  %v989_v13 = vmul.f32 %v2255_v26, %v2255_v26 }
 0x180   : > { %v917_v56 = vadd.f32 %v2251_v24, %v916_v4  ;;  %v1047_v4 = vadd.f32 %v1046_v60, %v984_v50  ;;  %v990_v60 = vmul.f32 %v2251_v24, %v2251_v24  ;;  %v3119_v24 = vld [vmem:[#allocation22_spill] sm:$0xff] }
 0x182   : > { %v918_v62 = vadd.f32 %v917_v56, %v2263_v30  ;;  %v1048_v56 = vadd.f32 %v1047_v4, %v985_v0  ;;  %v991_v4 = vmul.f32 %v2263_v30, %v2263_v30  ;;  %v3120_v30 = vld [vmem:[#allocation21_spill] sm:$0xff] }
 0x184   : > { %v919_v58 = vadd.f32 %v2259_v28, %v918_v62  ;;  %v1049_v62 = vadd.f32 %v1048_v56, %v986_v54  ;;  %v992_v56 = vmul.f32 %v2259_v28, %v2259_v28  ;;  %v3121_v28 = vld [vmem:[#allocation24_spill] sm:$0xff] }
 0x186   : > { %v920_v52 = vadd.f32 %v919_v58, %v2271_v34  ;;  %v1050_v58 = vadd.f32 %v1049_v62, %v987_v6  ;;  %v993_v62 = vmul.f32 %v2271_v34, %v2271_v34  ;;  %v3122_v34 = vld [vmem:[#allocation23_spill] sm:$0xff] }
 0x188   : > { %v921_v2 = vadd.f32 %v2267_v32, %v920_v52  ;;  %v1051_v52 = vadd.f32 %v1050_v58, %v988_v48  ;;  %v994_v58 = vmul.f32 %v2267_v32, %v2267_v32  ;;  %v3123_v32 = vld [vmem:[#allocation26_spill] sm:$0xff] }
 0x18a   : > { %v922_v9 = vadd.f32 %v921_v2, %v2279_v38  ;;  %v1052_v2 = vadd.f32 %v1051_v52, %v989_v13  ;;  %v995_v52 = vmul.f32 %v2279_v38, %v2279_v38  ;;  %v3124_v38 = vld [vmem:[#allocation25_spill] sm:$0xff] }
 0x18c   : > { %v923_v7 = vadd.f32 %v2275_v36, %v922_v9  ;;  %v1053_v9 = vadd.f32 %v1052_v2, %v990_v60  ;;  %v996_v2 = vmul.f32 %v2275_v36, %v2275_v36  ;;  %v3125_v36 = vld [vmem:[#allocation28_spill] sm:$0xff] }
 0x18e   : > { %v924_v50 = vadd.f32 %v923_v7, %v2287_v42  ;;  %v1054_v7 = vadd.f32 %v1053_v9, %v991_v4  ;;  %v997_v9 = vmul.f32 %v2287_v42, %v2287_v42  ;;  %v3126_v42 = vld [vmem:[#allocation27_spill] sm:$0xff] }
 0x190   : > { %v925_v0 = vadd.f32 %v2283_v40, %v924_v50  ;;  %v1055_v50 = vadd.f32 %v1054_v7, %v992_v56  ;;  %v998_v7 = vmul.f32 %v2283_v40, %v2283_v40  ;;  %v3127_v40 = vld [vmem:[#allocation30_spill] sm:$0xff] }
 0x192   : > { %v926_v54 = vadd.f32 %v925_v0, %v2295_v46  ;;  %v1056_v0 = vadd.f32 %v1055_v50, %v993_v62  ;;  %v999_v50 = vmul.f32 %v2295_v46, %v2295_v46  ;;  %v3128_v46 = vld [vmem:[#allocation29_spill] sm:$0xff] }
 0x194   : > { %v927_v6 = vadd.f32 %v2291_v44, %v926_v54  ;;  %v1057_v54 = vadd.f32 %v1056_v0, %v994_v58  ;;  %v1000_v0 = vmul.f32 %v2291_v44, %v2291_v44  ;;  %v3129_v44 = vld [vmem:[#allocation32_spill] sm:$0xff] }
 0x196   : > { %v928_v48 = vadd.f32 %v927_v6, %v3119_v24  ;;  %v1058_v6 = vadd.f32 %v1057_v54, %v995_v52  ;;  %v1001_v54 = vmul.f32 %v3119_v24, %v3119_v24  ;;  %v3130_v24 = vld [vmem:[#allocation31_spill] sm:$0xff] }
 0x198   : > { %v929_v13 = vadd.f32 %v3120_v30, %v928_v48  ;;  %v1059_v48 = vadd.f32 %v1058_v6, %v996_v2  ;;  %v1002_v6 = vmul.f32 %v3120_v30, %v3120_v30 }
 0x19a   : > { %v930_v60 = vadd.f32 %v929_v13, %v3121_v28  ;;  %v1060_v13 = vadd.f32 %v1059_v48, %v997_v9  ;;  %v1003_v48 = vmul.f32 %v3121_v28, %v3121_v28  ;;  %v1007_v28 = vmul.f32 %v3125_v36, %v3125_v36 }
 0x19c   : > { %v931_v4 = vadd.f32 %v3122_v34, %v930_v60  ;;  %v1061_v60 = vadd.f32 %v1060_v13, %v998_v7  ;;  %v1004_v13 = vmul.f32 %v3122_v34, %v3122_v34  ;;  %v1008_v34 = vmul.f32 %v3126_v42, %v3126_v42 }
 0x19e   : > { %v932_v56 = vadd.f32 %v931_v4, %v3123_v32  ;;  %v1062_v4 = vadd.f32 %v1061_v60, %v999_v50  ;;  %v1005_v60 = vmul.f32 %v3123_v32, %v3123_v32  ;;  %v1009_v32 = vmul.f32 %v3127_v40, %v3127_v40 }
 0x1a0   : > { %v933_v62 = vadd.f32 %v3124_v38, %v932_v56  ;;  %v1063_v56 = vadd.f32 %v1062_v4, %v1000_v0  ;;  %v1006_v0 = vmul.f32 %v3124_v38, %v3124_v38  ;;  %v1010_v38 = vmul.f32 %v3128_v46, %v3128_v46 }
 0x1a2   : > { %v934_v58 = vadd.f32 %v933_v62, %v3125_v36  ;;  %v1064_v62 = vadd.f32 %v1063_v56, %v1001_v54  ;;  %v1011_v36 = vmul.f32 %v3129_v44, %v3129_v44 }
 0x1a4   : > { %v935_v52 = vadd.f32 %v3126_v42, %v934_v58  ;;  %v1065_v58 = vadd.f32 %v1064_v62, %v1002_v6  ;;  %v1012_v42 = vmul.f32 %v3130_v24, %v3130_v24 }
 0x1a6   : > { %v936_v2 = vadd.f32 %v935_v52, %v3127_v40  ;;  %v1066_v52 = vadd.f32 %v1065_v58, %v1003_v48 }
 0x1a8   : > { %v937_v9 = vadd.f32 %v3128_v46, %v936_v2  ;;  %v1067_v4 = vadd.f32 %v1066_v52, %v1004_v13  ;;  %v876_v13 = vld [vmem:[#allocation2] sm:$0x1] }
 0x1aa   : > { %v938_v7 = vadd.f32 %v937_v9, %v3129_v44  ;;  %v1068_v54 = vadd.f32 %v1067_v4, %v1005_v60 }
 0x1ac   : > { %v939_v50 = vadd.f32 %v3130_v24, %v938_v7  ;;  %v1069_v6 = vadd.f32 %v1068_v54, %v1006_v0  ;;  %v948_v54 = vld [vmem:[#allocation3] sm:$0x1] }
 0x1ae   : > { %v940_v30 = vrot.slane %v939_v50, 4  ;;  %v1070_v48 = vadd.f32 %v1069_v6, %v1007_v28 }
 0x1b0   : > { %v941_v2 = vadd.f32 %v940_v30, %v939_v50  ;;  %v1071_v7 = vadd.f32 %v1070_v48, %v1008_v34 }
 0x1b2   : > { %v942_v56 = vrot.slane %v941_v2, 2  ;;  %v1072_v50 = vadd.f32 %v1071_v7, %v1009_v32 }
 0x1b4   : > { %v943_v9 = vadd.f32 %v942_v56, %v941_v2  ;;  %v1073_v52 = vadd.f32 %v1072_v50, %v1010_v38 }
 0x1b6   : > { %v944_v62 = vrot.slane %v943_v9, 1  ;;  %v1074_v30 = vadd.f32 %v1073_v52, %v1011_v36 }
 0x1b8   : > { %v945_v58 = vadd.f32 %v944_v62, %v943_v9  ;;  %v1075_v40 = vadd.f32 %v1074_v30, %v1012_v42 }
 0x1ba   : > { %v946_v60 = vadd.f32 %v945_v58, %v876_v13  ;;  %v1076_v0 = vrot.slane %v1075_v40, 4 }
 0x1bc   : > { %947 = vst [vmem:[#allocation2] sm:$0x1] %v946_v60  ;;  %v1077_v4 = vadd.f32 %v1076_v0, %v1075_v40 }
 0x1be   : > { %v1078_v2 = vrot.slane %v1077_v4, 2 }
 0x1c0   : > { %v1079_v28 = vadd.f32 %v1078_v2, %v1077_v4 }
 0x1c2   : > { %v1080_v46 = vrot.slane %v1079_v28, 1 }
 0x1c4   : > { %v1081_v56 = vadd.f32 %v1080_v46, %v1079_v28 }
 0x1c6   : > { %v1082_v34 = vadd.f32 %v1081_v56, %v948_v54 }
 0x1c8   : > { %1083 = vst [vmem:[#allocation3] sm:$0x1] %v1082_v34 }
 0x1c9 PF: > { %p1602_p6 = scmp.ne.s32.totalorder %s1884_s15, 1 }
 0x1ca   : > { %v1088_v44 = vld [vmem:[#allocation2] sm:$0x1] (!%p1602_p6)  ;;  %v1097_v24 = vlaneseq (!%p1602_p6)  ;;  %v3131_v36 = vld [vmem:[#allocation8_spill] sm:$0xff] (!%p1602_p6)  ;;  %v3132_v60 = vld [vmem:[#allocation7_spill] sm:$0xff] (!%p1602_p6) }
 0x1cb   : > { %1087 = sbr.rel (%p1602_p6) target bundleno = 555 (0x22b), region = 48  ;;  %v1089_v9 = vmul.f32 (!%p1602_p6), 0.001953125, %v1088_v44  ;;  %v3133_v52 = vld [vmem:[#allocation9_spill] sm:$0xff] (!%p1602_p6)  ;;  %v2648_v44 = vld [vmem:[%s3051_s2] ss:$0 sm:$0xff] (!%p1602_p6)  ;;  %v3143_v34 = vld [vmem:[#allocation20_spill] sm:$0xff] (!%p1602_p6) }
 0x1cc   : > { %v1098_v48 = vshrl.u32 (!%p1602_p6), %v1097_v24, 7 }
 0x1cd   : > { %v1092_v62 = vmul.f32 (!%p1602_p6), %v1089_v9, %v1089_v9 }
 0x1ce   : > { %v1099_v38 = vsub.s32 (!%p1602_p6), 0, %v1098_v48  ;;  %v3136_v48 = vld [vmem:[#allocation11_spill] sm:$0xff] (!%p1602_p6) }
 0x1cf   : > { %v1090_v6 = vld [vmem:[#allocation3] sm:$0x1] (!%p1602_p6) }
 0x1d0   : > { %v1091_v32 = vmul.f32 (!%p1602_p6), 0.001953125, %v1090_v6  ;;  %v2541_v13 = vrot.slane (!%p1602_p6), %v1089_v9, %v1099_v38  ;;  %v3141_v9 = vld [vmem:[#allocation18_spill] sm:$0xff] (!%p1602_p6) }
 0x1d2   : > { %v1093_v7 = vsub.f32 %v1091_v32, %v1092_v62  ;;  %v1102_v50 = vsub.f32 %v3131_v36, %v2541_v13  ;;  %v1103_v42 = vsub.f32 %v3132_v60, %v2541_v13  ;;  %v1104_v30 = vsub.f32 %v3133_v52, %v2541_v13  ;;  %v3134_v60 = vld [vmem:[#allocation10_spill] sm:$0xff]  ;;  %v3135_v52 = vld [vmem:[#allocation12_spill] sm:$0xff]  ;;  %v3140_v32 = vld [vmem:[#allocation15_spill] sm:$0xff] }
 0x1d3   : > { %v1105_v40 = vsub.f32 %v2225_v11, %v2541_v13  ;;  %v1106_v0 = vsub.f32 %v2237_v17, %v2541_v13  ;;  %v1107_v4 = vsub.f32 %v2233_v15, %v2541_v13  ;;  %v1108_v2 = vsub.f32 %v2245_v21, %v2541_v13  ;;  %v3137_v62 = vld [vmem:[#allocation14_spill] sm:$0xff] }
 0x1d4   : > { %v1094_v58 = vadd.f32 1e-05, %v1093_v7  ;;  %v1109_v28 = vsub.f32 %v2241_v19, %v2541_v13  ;;  %v3138_v7 = vld [vmem:[#allocation13_spill] sm:$0xff]  ;;  %v2665_v17 = vld [vmem:[%s3052_s3] ss:$0 sm:$0xff] }
 0x1d6   : > { %1838 = vrsqrt.f32 %v1094_v58  ;;  %v3139_v58 = vld [vmem:[#allocation16_spill] sm:$0xff] }
 0x1e0   : > { %v1839_v24 = vpop.eup %1838 }
 0x1e1   : > { %v2637_v36 = vrot.slane %v1839_v24, %v1099_v38 }
 0x1e3   : > { %v1172_v54 = vmul.f32 %v2637_v36, %v1102_v50  ;;  %v1173_v6 = vmul.f32 %v2637_v36, %v1103_v42  ;;  %v1174_v46 = vmul.f32 %v2637_v36, %v1104_v30  ;;  %v1175_v15 = vmul.f32 %v2637_v36, %v1105_v40 }
 0x1e4   : > { %v1176_v24 = vmul.f32 %v2637_v36, %v1106_v0  ;;  %v1177_v19 = vmul.f32 %v2637_v36, %v1107_v4  ;;  %v1178_v56 = vmul.f32 %v2637_v36, %v1108_v2  ;;  %v1179_v21 = vmul.f32 %v2637_v36, %v1109_v28 }
 0x1e5   : > { %v1243_v50 = vmul.f32 %v2648_v44, %v1172_v54  ;;  %v1244_v42 = vmul.f32 %v2648_v44, %v1173_v6  ;;  %v1245_v30 = vmul.f32 %v2648_v44, %v1174_v46  ;;  %v1246_v40 = vmul.f32 %v2648_v44, %v1175_v15 }
 0x1e6   : > { %v1247_v11 = vmul.f32 %v2648_v44, %v1176_v24  ;;  %v1248_v38 = vmul.f32 %v2648_v44, %v1177_v19  ;;  %v1249_v0 = vmul.f32 %v2648_v44, %v1178_v56  ;;  %v1250_v4 = vmul.f32 %v2648_v44, %v1179_v21 }
 0x1e7   : > { %v1314_v2 = vadd.f32 %v2665_v17, %v1243_v50  ;;  %v1315_v28 = vadd.f32 %v2665_v17, %v1244_v42  ;;  %v1316_v54 = vadd.f32 %v2665_v17, %v1245_v30  ;;  %v1317_v6 = vadd.f32 %v2665_v17, %v1246_v40 }
 0x1e8   : > { %v1318_v46 = vadd.f32 %v2665_v17, %v1247_v11  ;;  %v1319_v15 = vadd.f32 %v2665_v17, %v1248_v38  ;;  %v1320_v24 = vadd.f32 %v2665_v17, %v1249_v0  ;;  %v1321_v19 = vadd.f32 %v2665_v17, %v1250_v4 }
 0x1e9   : > { %1378 = vst [vmem:[#allocation4] sm:$0xff] %v1314_v2  ;;  %1379 = vst [vmem:[#allocation4 + $0x8] sm:$0xff] %v1315_v28  ;;  %v3147_v21 = vsub.f32 %v2253_v25, %v2541_v13  ;;  %v3148_v50 = vsub.f32 %v2249_v23, %v2541_v13  ;;  %v3149_v38 = vsub.f32 %v2261_v29, %v2541_v13 }
 0x1ea   : > { %1380 = vst [vmem:[#allocation4 + $0x10] sm:$0xff] %v1316_v54  ;;  %1381 = vst [vmem:[#allocation4 + $0x18] sm:$0xff] %v1317_v6  ;;  %v3150_v30 = vsub.f32 %v2257_v27, %v2541_v13  ;;  %v3151_v25 = vsub.f32 %v2269_v33, %v2541_v13  ;;  %v3152_v0 = vsub.f32 %v2265_v31, %v2541_v13 }
 0x1eb   : > { %v1180_v56 = vmul.f32 %v2637_v36, %v3147_v21  ;;  %v1181_v11 = vmul.f32 %v2637_v36, %v3148_v50  ;;  %v1182_v42 = vmul.f32 %v2637_v36, %v3149_v38  ;;  %1382 = vst [vmem:[#allocation4 + $0x20] sm:$0xff] %v1318_v46  ;;  %1383 = vst [vmem:[#allocation4 + $0x28] sm:$0xff] %v1319_v15 }
 0x1ec   : > { %v1183_v40 = vmul.f32 %v2637_v36, %v3150_v30  ;;  %1384 = vst [vmem:[#allocation4 + $0x30] sm:$0xff] %v1320_v24  ;;  %1385 = vst [vmem:[#allocation4 + $0x38] sm:$0xff] %v1321_v19  ;;  %v1184_v23 = vmul.f32 %v2637_v36, %v3151_v25  ;;  %v1185_v29 = vmul.f32 %v2637_v36, %v3152_v0 }
 0x1ed   : > { %v3153_v4 = vsub.f32 %v2277_v37, %v2541_v13  ;;  %v3154_v2 = vsub.f32 %v2273_v35, %v2541_v13  ;;  %v1251_v54 = vmul.f32 %v2648_v44, %v1180_v56  ;;  %v1252_v33 = vmul.f32 %v2648_v44, %v1181_v11 }
 0x1ee   : > { %v1253_v6 = vmul.f32 %v2648_v44, %v1182_v42  ;;  %v1254_v31 = vmul.f32 %v2648_v44, %v1183_v40  ;;  %v1255_v46 = vmul.f32 %v2648_v44, %v1184_v23  ;;  %v1256_v15 = vmul.f32 %v2648_v44, %v1185_v29 }
 0x1ef   : > { %v1186_v27 = vmul.f32 %v2637_v36, %v3153_v4  ;;  %v1187_v28 = vmul.f32 %v2637_v36, %v3154_v2  ;;  %v1322_v35 = vadd.f32 %v2665_v17, %v1251_v54  ;;  %v1323_v19 = vadd.f32 %v2665_v17, %v1252_v33 }
 0x1f0   : > { %v1324_v21 = vadd.f32 %v2665_v17, %v1253_v6  ;;  %v1325_v56 = vadd.f32 %v2665_v17, %v1254_v31  ;;  %v1326_v50 = vadd.f32 %v2665_v17, %v1255_v46  ;;  %v1327_v11 = vadd.f32 %v2665_v17, %v1256_v15 }
 0x1f1   : > { %v1257_v37 = vmul.f32 %v2648_v44, %v1186_v27  ;;  %v1258_v24 = vmul.f32 %v2648_v44, %v1187_v28  ;;  %1386 = vst [vmem:[#allocation4 + $0x40] sm:$0xff] %v1322_v35  ;;  %1387 = vst [vmem:[#allocation4 + $0x48] sm:$0xff] %v1323_v19  ;;  %v3155_v30 = vsub.f32 %v2285_v41, %v2541_v13 }
 0x1f2   : > { %1388 = vst [vmem:[#allocation4 + $0x50] sm:$0xff] %v1324_v21  ;;  %1389 = vst [vmem:[#allocation4 + $0x58] sm:$0xff] %v1325_v56  ;;  %v3156_v25 = vsub.f32 %v2281_v39, %v2541_v13  ;;  %v3157_v0 = vsub.f32 %v2293_v45, %v2541_v13  ;;  %v3158_v4 = vsub.f32 %v2289_v43, %v2541_v13 }
 0x1f3   : > { %v1328_v38 = vadd.f32 %v2665_v17, %v1257_v37  ;;  %v1329_v42 = vadd.f32 %v2665_v17, %v1258_v24  ;;  %v1188_v40 = vmul.f32 %v2637_v36, %v3155_v30  ;;  %1390 = vst [vmem:[#allocation4 + $0x60] sm:$0xff] %v1326_v50  ;;  %1391 = vst [vmem:[#allocation4 + $0x68] sm:$0xff] %v1327_v11 }
 0x1f4   : > { %v1189_v23 = vmul.f32 %v2637_v36, %v3156_v25  ;;  %v1190_v29 = vmul.f32 %v2637_v36, %v3157_v0  ;;  %v1191_v27 = vmul.f32 %v2637_v36, %v3158_v4  ;;  %v3159_v41 = vsub.f32 %v2301_v49, %v2541_v13 }
 0x1f5   : > { %1392 = vst [vmem:[#allocation4 + $0x70] sm:$0xff] %v1328_v38  ;;  %1393 = vst [vmem:[#allocation4 + $0x78] sm:$0xff] %v1329_v42  ;;  %v3160_v2 = vsub.f32 %v2297_v47, %v2541_v13  ;;  %v3161_v28 = vsub.f32 %v2309_v53, %v2541_v13  ;;  %v3162_v54 = vsub.f32 %v2305_v51, %v2541_v13 }
 0x1f6   : > { %v1192_v39 = vmul.f32 %v2637_v36, %v3159_v41  ;;  %v1259_v6 = vmul.f32 %v2648_v44, %v1188_v40  ;;  %v1260_v49 = vmul.f32 %v2648_v44, %v1189_v23  ;;  %v1261_v31 = vmul.f32 %v2648_v44, %v1190_v29 }
 0x1f7   : > { %v1193_v45 = vmul.f32 %v2637_v36, %v3160_v2  ;;  %v1194_v43 = vmul.f32 %v2637_v36, %v3161_v28  ;;  %v1195_v33 = vmul.f32 %v2637_v36, %v3162_v54  ;;  %v1262_v47 = vmul.f32 %v2648_v44, %v1191_v27 }
 0x1f8   : > { %v1263_v46 = vmul.f32 %v2648_v44, %v1192_v39  ;;  %v1330_v51 = vadd.f32 %v2665_v17, %v1259_v6  ;;  %v1331_v24 = vadd.f32 %v2665_v17, %v1260_v49  ;;  %v1332_v35 = vadd.f32 %v2665_v17, %v1261_v31 }
 0x1f9   : > { %v1264_v15 = vmul.f32 %v2648_v44, %v1193_v45  ;;  %v1265_v53 = vmul.f32 %v2648_v44, %v1194_v43  ;;  %v1266_v37 = vmul.f32 %v2648_v44, %v1195_v33  ;;  %v1333_v19 = vadd.f32 %v2665_v17, %v1262_v47 }
 0x1fa   : > { %v1334_v21 = vadd.f32 %v2665_v17, %v1263_v46  ;;  %1394 = vst [vmem:[#allocation4 + $0x80] sm:$0xff] %v1330_v51  ;;  %1395 = vst [vmem:[#allocation4 + $0x88] sm:$0xff] %v1331_v24  ;;  %v3163_v38 = vsub.f32 %v2317_v57, %v2541_v13  ;;  %v3164_v30 = vsub.f32 %v2313_v55, %v2541_v13 }
 0x1fb   : > { %v1335_v56 = vadd.f32 %v2665_v17, %v1264_v15  ;;  %v1336_v50 = vadd.f32 %v2665_v17, %v1265_v53  ;;  %v1337_v11 = vadd.f32 %v2665_v17, %v1266_v37  ;;  %1396 = vst [vmem:[#allocation4 + $0x90] sm:$0xff] %v1332_v35  ;;  %1397 = vst [vmem:[#allocation4 + $0x98] sm:$0xff] %v1333_v19 }
 0x1fc   : > { %v1196_v42 = vmul.f32 %v2637_v36, %v3163_v38  ;;  %v1197_v40 = vmul.f32 %v2637_v36, %v3164_v30  ;;  %v3165_v25 = vsub.f32 %v2325_v61, %v2541_v13  ;;  %v3166_v0 = vsub.f32 %v2321_v59, %v2541_v13  ;;  %1398 = vst [vmem:[#allocation4 + $0xa0] sm:$0xff] %v1334_v21 }
 0x1fd   : > { %1399 = vst [vmem:[#allocation4 + $0xa8] sm:$0xff] %v1335_v56  ;;  %1400 = vst [vmem:[#allocation4 + $0xb0] sm:$0xff] %v1336_v50  ;;  %v3167_v57 = vsub.f32 %v2333_v1, %v2541_v13  ;;  %v3168_v4 = vsub.f32 %v2329_v63, %v2541_v13  ;;  %v3169_v27 = vsub.f32 %v2341_v5, %v2541_v13 }
 0x1fe   : > { %v1198_v23 = vmul.f32 %v2637_v36, %v3165_v25  ;;  %v1199_v29 = vmul.f32 %v2637_v36, %v3166_v0  ;;  %1401 = vst [vmem:[#allocation4 + $0xb8] sm:$0xff] %v1337_v11  ;;  %v3170_v41 = vsub.f32 %v2337_v3, %v2541_v13  ;;  %v1267_v2 = vmul.f32 %v2648_v44, %v1196_v42 }
 0x1ff   : > { %v1200_v55 = vmul.f32 %v2637_v36, %v3167_v57  ;;  %v1201_v61 = vmul.f32 %v2637_v36, %v3168_v4  ;;  %v1202_v59 = vmul.f32 %v2637_v36, %v3169_v27  ;;  %v1268_v1 = vmul.f32 %v2648_v44, %v1197_v40 }
 0x200   : > { %v1203_v39 = vmul.f32 %v2637_v36, %v3170_v41  ;;  %v1269_v45 = vmul.f32 %v2648_v44, %v1198_v23  ;;  %v1270_v63 = vmul.f32 %v2648_v44, %v1199_v29  ;;  %v1338_v3 = vadd.f32 %v2665_v17, %v1267_v2 }
 0x201   : > { %v1271_v28 = vmul.f32 %v2648_v44, %v1200_v55  ;;  %v1272_v43 = vmul.f32 %v2648_v44, %v1201_v61  ;;  %v1273_v5 = vmul.f32 %v2648_v44, %v1202_v59  ;;  %v1339_v33 = vadd.f32 %v2665_v17, %v1268_v1 }
 0x202   : > { %v1274_v54 = vmul.f32 %v2648_v44, %v1203_v39  ;;  %v1340_v6 = vadd.f32 %v2665_v17, %v1269_v45  ;;  %v1341_v49 = vadd.f32 %v2665_v17, %v1270_v63  ;;  %1402 = vst [vmem:[#allocation4 + $0xc0] sm:$0xff] %v1338_v3  ;;  %v3171_v53 = vsub.f32 %v2223_v10, %v2541_v13 }
 0x203   : > { %v1342_v31 = vadd.f32 %v2665_v17, %v1271_v28  ;;  %v1343_v47 = vadd.f32 %v2665_v17, %v1272_v43  ;;  %v1344_v46 = vadd.f32 %v2665_v17, %v1273_v5  ;;  %1403 = vst [vmem:[#allocation4 + $0xc8] sm:$0xff] %v1339_v33  ;;  %v3172_v51 = vsub.f32 %v2219_v8, %v2541_v13 }
 0x204   : > { %v1345_v15 = vadd.f32 %v2665_v17, %v1274_v54  ;;  %1404 = vst [vmem:[#allocation4 + $0xd0] sm:$0xff] %v1340_v6  ;;  %1405 = vst [vmem:[#allocation4 + $0xd8] sm:$0xff] %v1341_v49  ;;  %v1204_v37 = vmul.f32 %v2637_v36, %v3171_v53  ;;  %v3173_v35 = vsub.f32 %v2231_v14, %v2541_v13 }
 0x205   : > { %v1205_v24 = vmul.f32 %v2637_v36, %v3172_v51  ;;  %v3174_v21 = vsub.f32 %v2227_v12, %v2541_v13  ;;  %1406 = vst [vmem:[#allocation4 + $0xe0] sm:$0xff] %v1342_v31  ;;  %1407 = vst [vmem:[#allocation4 + $0xe8] sm:$0xff] %v1343_v47  ;;  %v3175_v10 = vsub.f32 %v2239_v18, %v2541_v13 }
 0x206   : > { %v1206_v19 = vmul.f32 %v2637_v36, %v3173_v35  ;;  %1408 = vst [vmem:[#allocation4 + $0xf0] sm:$0xff] %v1344_v46  ;;  %1409 = vst [vmem:[#allocation4 + $0xf8] sm:$0xff] %v1345_v15  ;;  %v3176_v50 = vsub.f32 %v2235_v16, %v2541_v13  ;;  %v3177_v11 = vsub.f32 %v2247_v22, %v2541_v13 }
 0x207   : > { %v1207_v56 = vmul.f32 %v2637_v36, %v3174_v21  ;;  %v1208_v8 = vmul.f32 %v2637_v36, %v3175_v10  ;;  %v3178_v38 = vsub.f32 %v2243_v20, %v2541_v13  ;;  %v1275_v30 = vmul.f32 %v2648_v44, %v1204_v37  ;;  %v3188_v10 = vld [vmem:[#allocation17_spill] sm:$0xff] }
 0x208   : > { %v1209_v14 = vmul.f32 %v2637_v36, %v3176_v50  ;;  %v1210_v12 = vmul.f32 %v2637_v36, %v3177_v11  ;;  %v1276_v18 = vmul.f32 %v2648_v44, %v1205_v24  ;;  %v1277_v40 = vmul.f32 %v2648_v44, %v1206_v19 }
 0x209   : > { %v1211_v42 = vmul.f32 %v2637_v36, %v3178_v38  ;;  %v1278_v16 = vmul.f32 %v2648_v44, %v1207_v56  ;;  %v1279_v25 = vmul.f32 %v2648_v44, %v1208_v8  ;;  %v1346_v20 = vadd.f32 %v2665_v17, %v1275_v30 }
 0x20a   : > { %v1280_v23 = vmul.f32 %v2648_v44, %v1209_v14  ;;  %v1281_v22 = vmul.f32 %v2648_v44, %v1210_v12  ;;  %v1347_v29 = vadd.f32 %v2665_v17, %v1276_v18  ;;  %v1348_v57 = vadd.f32 %v2665_v17, %v1277_v40  ;;  %v3191_v12 = vld [vmem:[#allocation19_spill] sm:$0xff]  ;;  %v3195_v40 = vld [vmem:[#allocation21_spill] sm:$0xff] }
 0x20b   : > { %v1282_v0 = vmul.f32 %v2648_v44, %v1211_v42  ;;  %v1349_v55 = vadd.f32 %v2665_v17, %v1278_v16  ;;  %v1350_v4 = vadd.f32 %v2665_v17, %v1279_v25  ;;  %1410 = vst [vmem:[#allocation4 + $0x100] sm:$0xff] %v1346_v20  ;;  %v3179_v41 = vsub.f32 %v2255_v26, %v2541_v13  ;;  %v3197_v25 = vld [vmem:[#allocation24_spill] sm:$0xff] }
 0x20c   : > { %v1351_v61 = vadd.f32 %v2665_v17, %v1280_v23  ;;  %v1352_v27 = vadd.f32 %v2665_v17, %v1281_v22  ;;  %1411 = vst [vmem:[#allocation4 + $0x108] sm:$0xff] %v1347_v29  ;;  %1412 = vst [vmem:[#allocation4 + $0x110] sm:$0xff] %v1348_v57  ;;  %v3180_v2 = vsub.f32 %v3134_v60, %v2541_v13  ;;  %v3198_v22 = vld [vmem:[#allocation23_spill] sm:$0xff] }
 0x20d   : > { %v1353_v59 = vadd.f32 %v2665_v17, %v1282_v0  ;;  %1413 = vst [vmem:[#allocation4 + $0x118] sm:$0xff] %v1349_v55  ;;  %v1212_v39 = vmul.f32 %v2637_v36, %v3179_v41  ;;  %v3181_v45 = vsub.f32 %v3135_v52, %v2541_v13  ;;  %v3182_v28 = vsub.f32 %v3136_v48, %v2541_v13 }
 0x20e   : > { %v1213_v1 = vmul.f32 %v2637_v36, %v3180_v2  ;;  %1414 = vst [vmem:[#allocation4 + $0x120] sm:$0xff] %v1350_v4  ;;  %1415 = vst [vmem:[#allocation4 + $0x128] sm:$0xff] %v1351_v61  ;;  %v3183_v26 = vsub.f32 %v3137_v62, %v2541_v13  ;;  %v3184_v5 = vsub.f32 %v3138_v7, %v2541_v13 }
 0x20f   : > { %v1214_v63 = vmul.f32 %v2637_v36, %v3181_v45  ;;  %v1215_v43 = vmul.f32 %v2637_v36, %v3182_v28  ;;  %1416 = vst [vmem:[#allocation4 + $0x130] sm:$0xff] %v1352_v27  ;;  %1417 = vst [vmem:[#allocation4 + $0x138] sm:$0xff] %v1353_v59  ;;  %v3185_v54 = vsub.f32 %v3139_v58, %v2541_v13 }
 0x210   : > { %v1216_v60 = vmul.f32 %v2637_v36, %v3183_v26  ;;  %v1217_v52 = vmul.f32 %v2637_v36, %v3184_v5  ;;  %v3186_v3 = vsub.f32 %v3140_v32, %v2541_v13  ;;  %v1283_v6 = vmul.f32 %v2648_v44, %v1212_v39  ;;  %v3199_v26 = vld [vmem:[#allocation26_spill] sm:$0xff]  ;;  %v3200_v5 = vld [vmem:[#allocation25_spill] sm:$0xff] }
 0x211   : > { %v1218_v48 = vmul.f32 %v2637_v36, %v3185_v54  ;;  %v1284_v62 = vmul.f32 %v2648_v44, %v1213_v1  ;;  %v1285_v49 = vmul.f32 %v2648_v44, %v1214_v63  ;;  %v1286_v7 = vmul.f32 %v2648_v44, %v1215_v43  ;;  %v3201_v54 = vld [vmem:[#allocation28_spill] sm:$0xff] }
 0x212   : > { %v1219_v33 = vmul.f32 %v2637_v36, %v3186_v3  ;;  %v1287_v31 = vmul.f32 %v2648_v44, %v1216_v60  ;;  %v1288_v47 = vmul.f32 %v2648_v44, %v1217_v52  ;;  %v1354_v32 = vadd.f32 %v2665_v17, %v1283_v6  ;;  %v3202_v3 = vld [vmem:[#allocation27_spill] sm:$0xff] }
 0x213   : > { %v1289_v58 = vmul.f32 %v2648_v44, %v1218_v48  ;;  %v1355_v15 = vadd.f32 %v2665_v17, %v1284_v62  ;;  %v1356_v53 = vadd.f32 %v2665_v17, %v1285_v49  ;;  %v1357_v37 = vadd.f32 %v2665_v17, %v1286_v7  ;;  %v3203_v49 = vld [vmem:[#allocation30_spill] sm:$0xff] }
 0x214   : > { %v1290_v46 = vmul.f32 %v2648_v44, %v1219_v33  ;;  %v1358_v51 = vadd.f32 %v2665_v17, %v1287_v31  ;;  %v1359_v24 = vadd.f32 %v2665_v17, %v1288_v47  ;;  %1418 = vst [vmem:[#allocation4 + $0x140] sm:$0xff] %v1354_v32  ;;  %v3187_v21 = vsub.f32 %v3141_v9, %v2541_v13  ;;  %v3193_v9 = vld [vmem:[#allocation22_spill] sm:$0xff]  ;;  %v3204_v31 = vld [vmem:[#allocation29_spill] sm:$0xff] }
 0x215   : > { %v1360_v35 = vadd.f32 %v2665_v17, %v1289_v58  ;;  %1419 = vst [vmem:[#allocation4 + $0x148] sm:$0xff] %v1355_v15  ;;  %1420 = vst [vmem:[#allocation4 + $0x150] sm:$0xff] %v1356_v53  ;;  %v3189_v8 = vsub.f32 %v3188_v10, %v2541_v13  ;;  %v3190_v14 = vsub.f32 %v3143_v34, %v2541_v13 }
 0x216   : > { %v1361_v19 = vadd.f32 %v2665_v17, %v1290_v46  ;;  %1421 = vst [vmem:[#allocation4 + $0x158] sm:$0xff] %v1357_v37  ;;  %v1220_v56 = vmul.f32 %v2637_v36, %v3187_v21  ;;  %v3192_v38 = vsub.f32 %v3191_v12, %v2541_v13  ;;  %1422 = vst [vmem:[#allocation4 + $0x160] sm:$0xff] %v1358_v51  ;;  %v3205_v51 = vld [vmem:[#allocation32_spill] sm:$0xff] }
 0x217   : > { %v1221_v50 = vmul.f32 %v2637_v36, %v3189_v8  ;;  %v1222_v11 = vmul.f32 %v2637_v36, %v3190_v14  ;;  %1423 = vst [vmem:[#allocation4 + $0x168] sm:$0xff] %v1359_v24  ;;  %1424 = vst [vmem:[#allocation4 + $0x170] sm:$0xff] %v1360_v35  ;;  %v3194_v30 = vsub.f32 %v3193_v9, %v2541_v13  ;;  %v3206_v35 = vld [vmem:[#allocation31_spill] sm:$0xff] }
 0x218   : > { %v1223_v42 = vmul.f32 %v2637_v36, %v3192_v38  ;;  %1425 = vst [vmem:[#allocation4 + $0x178] sm:$0xff] %v1361_v19  ;;  %v3196_v16 = vsub.f32 %v3195_v40, %v2541_v13  ;;  %v1156_v23 = vsub.f32 %v3197_v25, %v2541_v13  ;;  %v1157_v0 = vsub.f32 %v3198_v22, %v2541_v13 }
 0x219   : > { %v1224_v18 = vmul.f32 %v2637_v36, %v3194_v30  ;;  %v1291_v20 = vmul.f32 %v2648_v44, %v1220_v56  ;;  %v1292_v29 = vmul.f32 %v2648_v44, %v1221_v50  ;;  %v1293_v57 = vmul.f32 %v2648_v44, %v1222_v11 }
 0x21a   : > { %v1225_v34 = vmul.f32 %v2637_v36, %v3196_v16  ;;  %v1294_v55 = vmul.f32 %v2648_v44, %v1223_v42  ;;  %v1226_v27 = vmul.f32 %v2637_v36, %v1156_v23  ;;  %v1227_v59 = vmul.f32 %v2637_v36, %v1157_v0 }
 0x21b   : > { %v1295_v4 = vmul.f32 %v2648_v44, %v1224_v18  ;;  %v1362_v41 = vadd.f32 %v2665_v17, %v1291_v20  ;;  %v1363_v39 = vadd.f32 %v2665_v17, %v1292_v29  ;;  %v1364_v2 = vadd.f32 %v2665_v17, %v1293_v57 }
 0x21c   : > { %v1296_v61 = vmul.f32 %v2648_v44, %v1225_v34  ;;  %v1365_v1 = vadd.f32 %v2665_v17, %v1294_v55  ;;  %v1297_v28 = vmul.f32 %v2648_v44, %v1226_v27  ;;  %v1298_v43 = vmul.f32 %v2648_v44, %v1227_v59 }
 0x21d   : > { %v1366_v45 = vadd.f32 %v2665_v17, %v1295_v4  ;;  %1426 = vst [vmem:[#allocation4 + $0x180] sm:$0xff] %v1362_v41  ;;  %1427 = vst [vmem:[#allocation4 + $0x188] sm:$0xff] %v1363_v39  ;;  %v1158_v60 = vsub.f32 %v3199_v26, %v2541_v13  ;;  %v1159_v52 = vsub.f32 %v3200_v5, %v2541_v13 }
 0x21e   : > { %v1367_v63 = vadd.f32 %v2665_v17, %v1296_v61  ;;  %1428 = vst [vmem:[#allocation4 + $0x190] sm:$0xff] %v1364_v2  ;;  %1429 = vst [vmem:[#allocation4 + $0x198] sm:$0xff] %v1365_v1  ;;  %v1160_v48 = vsub.f32 %v3201_v54, %v2541_v13  ;;  %v1161_v33 = vsub.f32 %v3202_v3, %v2541_v13 }
 0x21f   : > { %1430 = vst [vmem:[#allocation4 + $0x1a0] sm:$0xff] %v1366_v45  ;;  %v1368_v6 = vadd.f32 %v2665_v17, %v1297_v28  ;;  %v1369_v62 = vadd.f32 %v2665_v17, %v1298_v43  ;;  %v1162_v7 = vsub.f32 %v3203_v49, %v2541_v13  ;;  %v1163_v47 = vsub.f32 %v3204_v31, %v2541_v13 }
 0x220   : > { %1431 = vst [vmem:[#allocation4 + $0x1a8] sm:$0xff] %v1367_v63  ;;  %v1228_v58 = vmul.f32 %v2637_v36, %v1158_v60  ;;  %v1229_v46 = vmul.f32 %v2637_v36, %v1159_v52  ;;  %v1230_v32 = vmul.f32 %v2637_v36, %v1160_v48  ;;  %v1231_v15 = vmul.f32 %v2637_v36, %v1161_v33 }
 0x221   : > { %1432 = vst [vmem:[#allocation4 + $0x1b0] sm:$0xff] %v1368_v6  ;;  %1433 = vst [vmem:[#allocation4 + $0x1b8] sm:$0xff] %v1369_v62  ;;  %v1232_v53 = vmul.f32 %v2637_v36, %v1162_v7  ;;  %v1233_v37 = vmul.f32 %v2637_v36, %v1163_v47  ;;  %v1164_v24 = vsub.f32 %v3205_v51, %v2541_v13 }
 0x222   : > { %v1165_v19 = vsub.f32 %v3206_v35, %v2541_v13  ;;  %v1299_v21 = vmul.f32 %v2648_v44, %v1228_v58  ;;  %v1300_v56 = vmul.f32 %v2648_v44, %v1229_v46  ;;  %v1301_v10 = vmul.f32 %v2648_v44, %v1230_v32 }
 0x223   : > { %v1302_v8 = vmul.f32 %v2648_v44, %v1231_v15  ;;  %v1303_v50 = vmul.f32 %v2648_v44, %v1232_v53  ;;  %v1304_v14 = vmul.f32 %v2648_v44, %v1233_v37  ;;  %v1234_v11 = vmul.f32 %v2637_v36, %v1164_v24 }
 0x224   : > { %v1235_v12 = vmul.f32 %v2637_v36, %v1165_v19  ;;  %v1370_v38 = vadd.f32 %v2665_v17, %v1299_v21  ;;  %v1371_v13 = vadd.f32 %v2665_v17, %v1300_v56  ;;  %v1372_v42 = vadd.f32 %v2665_v17, %v1301_v10 }
 0x225   : > { %v1373_v9 = vadd.f32 %v2665_v17, %v1302_v8  ;;  %v1374_v30 = vadd.f32 %v2665_v17, %v1303_v50  ;;  %v1375_v18 = vadd.f32 %v2665_v17, %v1304_v14  ;;  %v1305_v40 = vmul.f32 %v2648_v44, %v1234_v11 }
 0x226   : > { %v1306_v16 = vmul.f32 %v2648_v44, %v1235_v12  ;;  %1434 = vst [vmem:[#allocation4 + $0x1c0] sm:$0xff] %v1370_v38  ;;  %1435 = vst [vmem:[#allocation4 + $0x1c8] sm:$0xff] %v1371_v13 }
 0x227   : > { %1436 = vst [vmem:[#allocation4 + $0x1d0] sm:$0xff] %v1372_v42  ;;  %1437 = vst [vmem:[#allocation4 + $0x1d8] sm:$0xff] %v1373_v9  ;;  %v1376_v36 = vadd.f32 %v2665_v17, %v1305_v40 }
 0x228   : > { %1438 = vst [vmem:[#allocation4 + $0x1e0] sm:$0xff] %v1374_v30  ;;  %1439 = vst [vmem:[#allocation4 + $0x1e8] sm:$0xff] %v1375_v18  ;;  %v1377_v34 = vadd.f32 %v2665_v17, %v1306_v16 }
 0x229   : > { %1440 = vst [vmem:[#allocation4 + $0x1f0] sm:$0xff] %v1376_v36 }
 0x22a   : > { %1441 = vst [vmem:[#allocation4 + $0x1f8] sm:$0xff] %v1377_v34 }
 0x22b PF: > { %p3015_p7 = scmp.eq.s32.totalorder %s1530_s18, 1  ;;  %s1895_s23 = smov [#allocation4]  }
 0x22c   : > { %s1457_s24 = sshll.u32 %s1895_s23, 4  ;;  %s1458_s24 = int_to_ptr.vmem [resolvable:$true] %s1457_s24 }
 0x22d   : > { %s1840_s25 = scalar_lea.vmem %s1458_s24, 8192  ;;  %s1846_s26 = scalar_lea.vmem %s1458_s24, 16384 }
 0x22e   : > { %p1841_p8 = scmp.ne.s32.totalorder %s1458_s24, %s1840_s25  ;;  %p1847_p11 = scmp.lt.s32.totalorder %s1458_s24, %s1458_s24 }
 0x22f   : > { %p1848_p12 = scmp.lt.s32.totalorder %s1846_s26, %s1840_s25 }
 0x230   : > { %p1842_p9 = pnand %p1841_p8, %p3015_p7 }
 0x231   : > { %p1849_p13 = por %p1848_p12, %p1847_p11 }
 0x232   : > { %p1843_p10 = pneg %p1842_p9 }
 0x234   : > { %p1850_p0 = pnand %p1849_p13, %p1843_p10 }
 0x236   : > { %1853 = shalt.err (!%p1850_p0)
}
 0x237   : > { %s1854_s28 = scalar_lea.hbm %s3053_s4, 8192 }
 0x238   : > { %p1855_p1 = scmp.ne.s32.totalorder %s3053_s4, %s1854_s28  ;;  %p1860_p4 = scmp.lt.u32.totalorder %s1854_s28, %s3053_s4 }
 0x23a   : > { %p1856_p2 = pnand %p1855_p1, %p3015_p7 }
 0x23c   : > { %p1857_p3 = pneg %p1856_p2 }
 0x23e   : > { %p1862_p5 = pnand %p1860_p4, %p1857_p3 }
 0x240   : > { %1865 = shalt.err (!%p1862_p5)
}
 0x241   : > { %s1896_s7 = smov 128   ;;  %s1897_s8 = smov 8  }
 0x242   : > { %1800 = dma.vmem_to_hbm [thread:$0]  (%p3015_p7), %s1458_s24, 8192, %s3053_s4, [#allocation5], %s1896_s7, %s1896_s7, %s1897_s8  }
 0x243 PF: > { %p1808_p6 = scmp.ge.s32.totalorder %s1892_s17, 2  ;;  %p1809_p8 = scmp.eq.s32.totalorder %s1531_s19, 1 }
 0x245   : > { %p1804_p9 = pnand %p1809_p8, %p1808_p6 }
 0x247   : > { %1879 = dma.done.wait (!%p1804_p9), [#allocation5], 8192  }
 0x248   : > { %1881 = vsyncadd (!%p1804_p9), [#allocation5], 4294959104  ;;  %s17_s17 = sadd.s32 1, %s1892_s17   ;;  %s3208_s15 = smov %s1888_s16 }
 0x249   : > { %p14_p10 = scmp.ge.s32.totalorder %s17_s17, 4   ;;  %s3209_s16 = smov %s3211_s20 }
 0x24b   :  { %16 = sbr.rel (!%p14_p10) target bundleno = 3 (0x3), region = 83 }
 0x252   :  { %1478 = vsyncpa [#allocation5], 1 }
 0x253   :  { %1480 = vsyncpa [#allocation5 + $0x1], 1 }

</bundles_post_ra>
